<compile_context>
chip_gen: v6e
topology: v6e:2x2x1
jax: 0.10.0
libtpu: 0.0.40
codegen_flags: <defaults>
</compile_context>

<pallas_src>
import jax
import jax.numpy as jnp
import numpy as np
from jax import lax
from jax.experimental import pallas as pl
from jax.experimental.pallas import tpu as pltpu

KSIZE = 5
PAD = KSIZE // 2  # 2

# Per-step input-block budget (double-buffered by the pipeline) and limits.
_BLOCK_BUDGET_BYTES = 6 * 1024 * 1024
_MAX_TILE_N = 8
_VMEM_LIMIT_BYTES = 48 * 1024 * 1024   # <= v7x physical VMEM with headroom


def _largest_divisor_leq(n, cap, multiple_of=1):
    cap = int(max(1, min(n, cap)))
    for d in range(cap, 0, -1):
        if n % d == 0 and d % multiple_of == 0:
            return d
    return 0


def _make_kernel(C, H, W, tile_n, tile_c):
    HW = H * W
    OFF = PAD * W + PAD          # flat halo on each side of a padded plane
    L = HW + 2 * OFF             # flat padded-plane length
    inv_c = 1.0 / float(C)       # Python float -> literal (not a captured const)
    ch = _largest_divisor_leq(tile_c, 8)    # channels per reduction chunk
    n_chunks = tile_c // ch

    def kernel(w_ref, x_ref, o_ref, sum_ref, max_ref, padf_ref):
        # w_ref    : SMEM (2*KSIZE*KSIZE,) f32 flattened conv weight
        # x_ref    : VMEM (tile_n, tile_c, HW)   one channel tile, lane-dense
        # o_ref    : VMEM (tile_n, 1, HW)        revisited across the C axis
        # sum_ref  : VMEM (tile_n, HW) f32       running channel sum
        # max_ref  : VMEM (tile_n, HW) f32       running channel max
        # padf_ref : VMEM (2, tile_n, L) f32     flat zero-padded [avg, max]
        c_idx = pl.program_id(1)

        # ---- streamed channel reduction on lane-dense (tile_n, HW) planes ----
        if n_chunks == 1:
            xb = x_ref[...].astype(jnp.float32)
            part_sum = jnp.sum(xb, axis=1)
            part_max = jnp.max(xb, axis=1)
        else:
            def chunk_body(i, carry):
                s, m = carry
                off = pl.multiple_of(i * ch, ch)
                xc = x_ref[:, pl.ds(off, ch), :].astype(jnp.float32)
                return s + jnp.sum(xc, axis=1), jnp.maximum(m, jnp.max(xc, axis=1))

            init = (jnp.zeros((tile_n, HW), jnp.float32),
                    jnp.full((tile_n, HW), -jnp.inf, jnp.float32))
            part_sum, part_max = lax.fori_loop(
                0, n_chunks, chunk_body, init, unroll=min(8, n_chunks))

        @pl.when(c_idx == 0)
        def _init():
            sum_ref[...] = part_sum
            max_ref[...] = part_max
            # Zero only the halo strips (interior is fully overwritten at
            # finalize) -- once per sample tile, not a full clear per finalize.
            padf_ref[:, :, 0:OFF] = jnp.zeros((2, tile_n, OFF), jnp.float32)
            padf_ref[:, :, OFF + HW:L] = jnp.zeros((2, tile_n, OFF), jnp.float32)

        @pl.when(c_idx > 0)
        def _accumulate():
            sum_ref[...] = sum_ref[...] + part_sum
            max_ref[...] = jnp.maximum(max_ref[...], part_max)

        # Finalize once per sample tile: 5x5 conv over [avg, max] + sigmoid,
        # computed entirely in the flat lane-dense layout.
        @pl.when(c_idx == pl.num_programs(1) - 1)
        def _finalize():
            padf_ref[0, :, OFF:OFF + HW] = sum_ref[...] * inv_c
            padf_ref[1, :, OFF:OFF + HW] = max_ref[...]

            # Column-validity masks (horizontal halo) for each kw offset; the
            # vertical halo is handled by the zeroed flat border strips.
            col = lax.broadcasted_iota(jnp.int32, (tile_n, HW), 1) % W
            col_ok = [(col >= -dw) & (col < W - dw) for dw in range(-PAD, PAD + 1)]

            # Hoisted scalar weight reads (SMEM).
            ws = [w_ref[i] for i in range(2 * KSIZE * KSIZE)]

            acc = jnp.zeros((tile_n, HW), jnp.float32)
            for p in range(2):                       # 0: avg plane, 1: max plane
                for kh in range(KSIZE):
                    for kw in range(KSIZE):
                        d = (kh - PAD) * W + (kw - PAD)
                        # Each tap is a contiguous lane-dense slice of the flat
                        # padded plane (static offset).
                        tap = padf_ref[p, :, pl.ds(OFF + d, HW)]
                        if kw != PAD:
                            tap = jnp.where(col_ok[kw], tap, 0.0)
                        acc = acc + ws[p * KSIZE * KSIZE + kh * KSIZE + kw] * tap

            o_ref[:, 0, :] = jax.nn.sigmoid(acc).astype(o_ref.dtype)

    return kernel


def spatial_attention(x, weight, *, tile_n=None, tile_c=None):
    """x: (N, C, H, W), weight: (1, 2, 5, 5) -> (N, 1, H, W)."""
    N, C, H, W = x.shape
    assert weight.shape == (1, 2, KSIZE, KSIZE)
    HW = H * W
    w_flat = weight.reshape(-1).astype(jnp.float32)   # (50,)
    x_flat = x.reshape(N, C, HW)                      # lane-dense layout (free)

    if tile_n is None:
        tile_n = _largest_divisor_leq(N, _MAX_TILE_N)
    if tile_c is None:
        cap = max(1, _BLOCK_BUDGET_BYTES // max(1, tile_n * HW * x.dtype.itemsize))
        if C <= cap:
            tile_c = C
        else:
            # Prefer a sublane-aligned (multiple-of-8) channel tile.
            tile_c = (_largest_divisor_leq(C, cap, multiple_of=8)
                      or _largest_divisor_leq(C, cap))

    kernel = _make_kernel(C, H, W, tile_n, tile_c)
    grid = (N // tile_n, C // tile_c)   # channel (reduction) axis last
    L = HW + 2 * (PAD * W + PAD)

    out_flat = pl.pallas_call(
        kernel,
        out_shape=jax.ShapeDtypeStruct((N, 1, HW), x.dtype),
        grid_spec=pltpu.PrefetchScalarGridSpec(
            num_scalar_prefetch=0,
            grid=grid,
            in_specs=[
                # small conv weight lives in SMEM, read as scalars
                pl.BlockSpec(memory_space=pltpu.MemorySpace.SMEM),
                pl.BlockSpec((tile_n, tile_c, HW), lambda n, c: (n, c, 0)),
            ],
            # same output block across the C axis -> resident accumulator target
            out_specs=pl.BlockSpec((tile_n, 1, HW), lambda n, c: (n, 0, 0)),
            scratch_shapes=[
                pltpu.VMEM((tile_n, HW), jnp.float32),      # running sum
                pltpu.VMEM((tile_n, HW), jnp.float32),      # running max
                pltpu.VMEM((2, tile_n, L), jnp.float32),    # flat padded planes
            ],
        ),
        compiler_params=pltpu.CompilerParams(
            dimension_semantics=("parallel", "arbitrary"),
            vmem_limit_bytes=_VMEM_LIMIT_BYTES,
        ),
    )(w_flat, x_flat)
    return out_flat.reshape(N, 1, H, W)


def _reference(x, weight):
    """Pure-JAX reference mirroring the PyTorch forward."""
    avg_out = jnp.mean(x, axis=1, keepdims=True)
    max_out = jnp.max(x, axis=1, keepdims=True)
    combined = jnp.concatenate([avg_out, max_out], axis=1)   # (N, 2, H, W)
    out = jax.lax.conv_general_dilated(
        combined, weight,
        window_strides=(1, 1),
        padding=((PAD, PAD), (PAD, PAD)),
        dimension_numbers=("NCHW", "OIHW", "NCHW"),
    )
    return jax.nn.sigmoid(out)


if __name__ == "__main__":
    key = jax.random.PRNGKey(0)
    kx, kw = jax.random.split(key)

    N, C, H, W = 2, 4, 16, 16
    x = jax.random.normal(kx, (N, C, H, W), dtype=jnp.float32)

    # Deterministic conv weight (same shape as nn.Conv2d(2, 1, 5, bias=False)).
    fan_in = 2 * KSIZE * KSIZE
    bound = 1.0 / np.sqrt(fan_in)
    weight = jax.random.uniform(
        kw, (1, 2, KSIZE, KSIZE), dtype=jnp.float32, minval=-bound, maxval=bound
    )

    out = jax.block_until_ready(spatial_attention(x, weight))
    ref = jax.block_until_ready(_reference(x, weight))
    np.testing.assert_allclose(np.asarray(out), np.asarray(ref),
                               rtol=1e-5, atol=1e-5)

    print("KERNEL_OK")
</pallas_src>

<mosaic_0001>
module attributes {stable_mosaic.version = 11 : i64} {
  func.func @kernel(%arg0: i32, %arg1: i32, %arg2: memref<50xf32, #tpu.memory_space<smem>>, %arg3: memref<2x4x256xf32, #tpu.memory_space<vmem>>, %arg4: memref<2x1x256xf32, #tpu.memory_space<vmem>>, %arg5: memref<2x256xf32, #tpu.memory_space<vmem>>, %arg6: memref<2x256xf32, #tpu.memory_space<vmem>>, %arg7: memref<2x2x324xf32, #tpu.memory_space<vmem>>) attributes {dimension_semantics = [#tpu.dimension_semantics<parallel>, #tpu.dimension_semantics<arbitrary>], iteration_bounds = array<i64: 1, 1>, scalar_prefetch = 0 : i64, scratch_operands = 3 : i64, tpu.core_type = #tpu.core_type<tc>, window_params = [{transform_indices = @transform_0, window_bounds = array<i64: 50>}, {transform_indices = @transform_1, window_bounds = array<i64: 2, 4, 256>}, {transform_indices = @transform_2, window_bounds = array<i64: 2, 1, 256>}]} {
    %c0 = arith.constant 0 : index
    %c0_0 = arith.constant 0 : index
    %c0_1 = arith.constant 0 : index
    %0 = vector.load %arg3[%c0, %c0_0, %c0_1] : memref<2x4x256xf32, #tpu.memory_space<vmem>>, vector<2x4x256xf32>
    %cst = arith.constant dense<0.000000e+00> : vector<2x256xf32>
    %1 = vector.multi_reduction <add>, %0, %cst [1] : vector<2x4x256xf32> to vector<2x256xf32>
    %cst_2 = arith.constant dense<0xFF800000> : vector<2x256xf32>
    %2 = vector.multi_reduction <maximumf>, %0, %cst_2 [1] : vector<2x4x256xf32> to vector<2x256xf32>
    %c0_i32 = arith.constant 0 : i32
    %3 = arith.cmpi eq, %arg1, %c0_i32 : i32
    %4 = arith.extui %3 : i1 to i32
    %c0_i32_3 = arith.constant 0 : i32
    %5 = arith.cmpi ne, %4, %c0_i32_3 : i32
    scf.if %5 {
      %c0_8 = arith.constant 0 : index
      %c0_9 = arith.constant 0 : index
      %12 = vector.load %arg5[%c0_8, %c0_9] : memref<2x256xf32, #tpu.memory_space<vmem>>, vector<2x256xf32>
      tpu.vector_store %arg5[%c0_8, %c0_9], %1 {strides = array<i32>} : memref<2x256xf32, #tpu.memory_space<vmem>>, vector<2x256xf32>,
      %c0_10 = arith.constant 0 : index
      %c0_11 = arith.constant 0 : index
      %13 = vector.load %arg6[%c0_10, %c0_11] : memref<2x256xf32, #tpu.memory_space<vmem>>, vector<2x256xf32>
      tpu.vector_store %arg6[%c0_10, %c0_11], %2 {strides = array<i32>} : memref<2x256xf32, #tpu.memory_space<vmem>>, vector<2x256xf32>,
      %cst_12 = arith.constant 0.000000e+00 : f32
      %14 = vector.broadcast %cst_12 : f32 to vector<2x2x34xf32>
      %c0_13 = arith.constant 0 : index
      %c0_14 = arith.constant 0 : index
      %c0_15 = arith.constant 0 : index
      %15 = vector.load %arg7[%c0_13, %c0_14, %c0_15] : memref<2x2x324xf32, #tpu.memory_space<vmem>>, vector<2x2x34xf32>
      tpu.vector_store %arg7[%c0_13, %c0_14, %c0_15], %14 {strides = array<i32>} : memref<2x2x324xf32, #tpu.memory_space<vmem>>, vector<2x2x34xf32>,
      %cst_16 = arith.constant 0.000000e+00 : f32
      %16 = vector.broadcast %cst_16 : f32 to vector<2x2x34xf32>
      %c0_17 = arith.constant 0 : index
      %c0_18 = arith.constant 0 : index
      %c290 = arith.constant 290 : index
      %17 = vector.load %arg7[%c0_17, %c0_18, %c290] : memref<2x2x324xf32, #tpu.memory_space<vmem>>, vector<2x2x34xf32>
      tpu.vector_store %arg7[%c0_17, %c0_18, %c290], %16 {strides = array<i32>} : memref<2x2x324xf32, #tpu.memory_space<vmem>>, vector<2x2x34xf32>,
    } else {
    }
    %c0_i32_4 = arith.constant 0 : i32
    %6 = arith.cmpi sgt, %arg1, %c0_i32_4 : i32
    %7 = arith.extui %6 : i1 to i32
    %c0_i32_5 = arith.constant 0 : i32
    %8 = arith.cmpi ne, %7, %c0_i32_5 : i32
    scf.if %8 {
      %c0_8 = arith.constant 0 : index
      %c0_9 = arith.constant 0 : index
      %12 = vector.load %arg5[%c0_8, %c0_9] : memref<2x256xf32, #tpu.memory_space<vmem>>, vector<2x256xf32>
      %13 = arith.addf %12, %1 : vector<2x256xf32>
      %c0_10 = arith.constant 0 : index
      %c0_11 = arith.constant 0 : index
      %14 = vector.load %arg5[%c0_10, %c0_11] : memref<2x256xf32, #tpu.memory_space<vmem>>, vector<2x256xf32>
      tpu.vector_store %arg5[%c0_10, %c0_11], %13 {strides = array<i32>} : memref<2x256xf32, #tpu.memory_space<vmem>>, vector<2x256xf32>,
      %c0_12 = arith.constant 0 : index
      %c0_13 = arith.constant 0 : index
      %15 = vector.load %arg6[%c0_12, %c0_13] : memref<2x256xf32, #tpu.memory_space<vmem>>, vector<2x256xf32>
      %16 = arith.maximumf %15, %2 : vector<2x256xf32>
      %c0_14 = arith.constant 0 : index
      %c0_15 = arith.constant 0 : index
      %17 = vector.load %arg6[%c0_14, %c0_15] : memref<2x256xf32, #tpu.memory_space<vmem>>, vector<2x256xf32>
      tpu.vector_store %arg6[%c0_14, %c0_15], %16 {strides = array<i32>} : memref<2x256xf32, #tpu.memory_space<vmem>>, vector<2x256xf32>,
    } else {
    }
    %c0_i32_6 = arith.constant 0 : i32
    %9 = arith.cmpi eq, %arg1, %c0_i32_6 : i32
    %10 = arith.extui %9 : i1 to i32
    %c0_i32_7 = arith.constant 0 : i32
    %11 = arith.cmpi ne, %10, %c0_i32_7 : i32
    scf.if %11 {
      %c0_8 = arith.constant 0 : index
      %c0_9 = arith.constant 0 : index
      %12 = vector.load %arg5[%c0_8, %c0_9] : memref<2x256xf32, #tpu.memory_space<vmem>>, vector<2x256xf32>
      %cst_10 = arith.constant 2.500000e-01 : f32
      %13 = vector.broadcast %cst_10 : f32 to vector<2x256xf32>
      %14 = arith.mulf %12, %13 : vector<2x256xf32>
      %c0_11 = arith.constant 0 : index
      %c0_12 = arith.constant 0 : index
      %c34 = arith.constant 34 : index
      %15 = vector.load %arg7[%c0_11, %c0_12, %c34] : memref<2x2x324xf32, #tpu.memory_space<vmem>>, vector<1x2x256xf32>
      %16 = vector.shape_cast %15 : vector<1x2x256xf32> to vector<2x256xf32>
      %17 = vector.shape_cast %14 : vector<2x256xf32> to vector<1x2x256xf32>
      tpu.vector_store %arg7[%c0_11, %c0_12, %c34], %17 {strides = array<i32>} : memref<2x2x324xf32, #tpu.memory_space<vmem>>, vector<1x2x256xf32>,
      %c0_13 = arith.constant 0 : index
      %c0_14 = arith.constant 0 : index
      %18 = vector.load %arg6[%c0_13, %c0_14] : memref<2x256xf32, #tpu.memory_space<vmem>>, vector<2x256xf32>
      %c1 = arith.constant 1 : index
      %c0_15 = arith.constant 0 : index
      %c34_16 = arith.constant 34 : index
      %19 = vector.load %arg7[%c1, %c0_15, %c34_16] : memref<2x2x324xf32, #tpu.memory_space<vmem>>, vector<1x2x256xf32>
      %20 = vector.shape_cast %19 : vector<1x2x256xf32> to vector<2x256xf32>
      %21 = vector.shape_cast %18 : vector<2x256xf32> to vector<1x2x256xf32>
      tpu.vector_store %arg7[%c1, %c0_15, %c34_16], %21 {strides = array<i32>} : memref<2x2x324xf32, #tpu.memory_space<vmem>>, vector<1x2x256xf32>,
      %22 = tpu.iota {dimensions = array<i32: 1>} : vector<2x256xi32>
      %c16_i32 = arith.constant 16 : i32
      %c0_i32_17 = arith.constant 0 : i32
      %23 = arith.cmpi eq, %c16_i32, %c0_i32_17 : i32
      %c1_i32 = arith.constant 1 : i32
      %24 = arith.select %23, %c1_i32, %c16_i32 : i32
      %25 = vector.broadcast %24 : i32 to vector<2x256xi32>
      %26 = arith.remsi %22, %25 : vector<2x256xi32>
      %c0_i32_18 = arith.constant 0 : i32
      %27 = vector.broadcast %c0_i32_18 : i32 to vector<2x256xi32>
      %28 = arith.cmpi ne, %26, %27 : vector<2x256xi32>
      %c0_i32_19 = arith.constant 0 : i32
      %29 = vector.broadcast %c0_i32_19 : i32 to vector<2x256xi32>
      %30 = arith.cmpi slt, %26, %29 : vector<2x256xi32>
      %c0_i32_20 = arith.constant 0 : i32
      %31 = arith.cmpi slt, %24, %c0_i32_20 : i32
      %32 = vector.broadcast %31 : i1 to vector<2x256xi1>
      %33 = vector.broadcast %32 : vector<2x256xi1> to vector<2x256xi1>
      %34 = arith.xori %30, %33 : vector<2x256xi1>
      %35 = arith.andi %34, %28 : vector<2x256xi1>
      %36 = vector.broadcast %24 : i32 to vector<2x256xi32>
      %37 = arith.addi %26, %36 : vector<2x256xi32>
      %38 = arith.select %35, %37, %26 : vector<2x256xi1>, vector<2x256xi32>
      %c2_i32 = arith.constant 2 : i32
      %39 = vector.broadcast %c2_i32 : i32 to vector<2x256xi32>
      %40 = arith.cmpi sge, %38, %39 : vector<2x256xi32>
      %c18_i32 = arith.constant 18 : i32
      %41 = vector.broadcast %c18_i32 : i32 to vector<2x256xi32>
      %42 = arith.cmpi slt, %38, %41 : vector<2x256xi32>
      %43 = arith.andi %40, %42 : vector<2x256xi1>
      %c1_i32_21 = arith.constant 1 : i32
      %44 = vector.broadcast %c1_i32_21 : i32 to vector<2x256xi32>
      %45 = arith.cmpi sge, %38, %44 : vector<2x256xi32>
      %c17_i32 = arith.constant 17 : i32
      %46 = vector.broadcast %c17_i32 : i32 to vector<2x256xi32>
      %47 = arith.cmpi slt, %38, %46 : vector<2x256xi32>
      %48 = arith.andi %45, %47 : vector<2x256xi1>
      %c-1_i32 = arith.constant -1 : i32
      %49 = vector.broadcast %c-1_i32 : i32 to vector<2x256xi32>
      %50 = arith.cmpi sge, %38, %49 : vector<2x256xi32>
      %c15_i32 = arith.constant 15 : i32
      %51 = vector.broadcast %c15_i32 : i32 to vector<2x256xi32>
      %52 = arith.cmpi slt, %38, %51 : vector<2x256xi32>
      %53 = arith.andi %50, %52 : vector<2x256xi1>
      %c-2_i32 = arith.constant -2 : i32
      %54 = vector.broadcast %c-2_i32 : i32 to vector<2x256xi32>
      %55 = arith.cmpi sge, %38, %54 : vector<2x256xi32>
      %c14_i32 = arith.constant 14 : i32
      %56 = vector.broadcast %c14_i32 : i32 to vector<2x256xi32>
      %57 = arith.cmpi slt, %38, %56 : vector<2x256xi32>
      %58 = arith.andi %55, %57 : vector<2x256xi1>
      %c0_22 = arith.constant 0 : index
      %59 = memref.load %arg2[%c0_22] : memref<50xf32, #tpu.memory_space<smem>>
      %c1_23 = arith.constant 1 : index
      %60 = memref.load %arg2[%c1_23] : memref<50xf32, #tpu.memory_space<smem>>
      %c2 = arith.constant 2 : index
      %61 = memref.load %arg2[%c2] : memref<50xf32, #tpu.memory_space<smem>>
      %c3 = arith.constant 3 : index
      %62 = memref.load %arg2[%c3] : memref<50xf32, #tpu.memory_space<smem>>
      %c4 = arith.constant 4 : index
      %63 = memref.load %arg2[%c4] : memref<50xf32, #tpu.memory_space<smem>>
      %c5 = arith.constant 5 : index
      %64 = memref.load %arg2[%c5] : memref<50xf32, #tpu.memory_space<smem>>
      %c6 = arith.constant 6 : index
      %65 = memref.load %arg2[%c6] : memref<50xf32, #tpu.memory_space<smem>>
      %c7 = arith.constant 7 : index
      %66 = memref.load %arg2[%c7] : memref<50xf32, #tpu.memory_space<smem>>
      %c8 = arith.constant 8 : index
      %67 = memref.load %arg2[%c8] : memref<50xf32, #tpu.memory_space<smem>>
      %c9 = arith.constant 9 : index
      %68 = memref.load %arg2[%c9] : memref<50xf32, #tpu.memory_space<smem>>
      %c10 = arith.constant 10 : index
      %69 = memref.load %arg2[%c10] : memref<50xf32, #tpu.memory_space<smem>>
      %c11 = arith.constant 11 : index
      %70 = memref.load %arg2[%c11] : memref<50xf32, #tpu.memory_space<smem>>
      %c12 = arith.constant 12 : index
      %71 = memref.load %arg2[%c12] : memref<50xf32, #tpu.memory_space<smem>>
      %c13 = arith.constant 13 : index
      %72 = memref.load %arg2[%c13] : memref<50xf32, #tpu.memory_space<smem>>
      %c14 = arith.constant 14 : index
      %73 = memref.load %arg2[%c14] : memref<50xf32, #tpu.memory_space<smem>>
      %c15 = arith.constant 15 : index
      %74 = memref.load %arg2[%c15] : memref<50xf32, #tpu.memory_space<smem>>
      %c16 = arith.constant 16 : index
      %75 = memref.load %arg2[%c16] : memref<50xf32, #tpu.memory_space<smem>>
      %c17 = arith.constant 17 : index
      %76 = memref.load %arg2[%c17] : memref<50xf32, #tpu.memory_space<smem>>
      %c18 = arith.constant 18 : index
      %77 = memref.load %arg2[%c18] : memref<50xf32, #tpu.memory_space<smem>>
      %c19 = arith.constant 19 : index
      %78 = memref.load %arg2[%c19] : memref<50xf32, #tpu.memory_space<smem>>
      %c20 = arith.constant 20 : index
      %79 = memref.load %arg2[%c20] : memref<50xf32, #tpu.memory_space<smem>>
      %c21 = arith.constant 21 : index
      %80 = memref.load %arg2[%c21] : memref<50xf32, #tpu.memory_space<smem>>
      %c22 = arith.constant 22 : index
      %81 = memref.load %arg2[%c22] : memref<50xf32, #tpu.memory_space<smem>>
      %c23 = arith.constant 23 : index
      %82 = memref.load %arg2[%c23] : memref<50xf32, #tpu.memory_space<smem>>
      %c24 = arith.constant 24 : index
      %83 = memref.load %arg2[%c24] : memref<50xf32, #tpu.memory_space<smem>>
      %c25 = arith.constant 25 : index
      %84 = memref.load %arg2[%c25] : memref<50xf32, #tpu.memory_space<smem>>
      %c26 = arith.constant 26 : index
      %85 = memref.load %arg2[%c26] : memref<50xf32, #tpu.memory_space<smem>>
      %c27 = arith.constant 27 : index
      %86 = memref.load %arg2[%c27] : memref<50xf32, #tpu.memory_space<smem>>
      %c28 = arith.constant 28 : index
      %87 = memref.load %arg2[%c28] : memref<50xf32, #tpu.memory_space<smem>>
      %c29 = arith.constant 29 : index
      %88 = memref.load %arg2[%c29] : memref<50xf32, #tpu.memory_space<smem>>
      %c30 = arith.constant 30 : index
      %89 = memref.load %arg2[%c30] : memref<50xf32, #tpu.memory_space<smem>>
      %c31 = arith.constant 31 : index
      %90 = memref.load %arg2[%c31] : memref<50xf32, #tpu.memory_space<smem>>
      %c32 = arith.constant 32 : index
      %91 = memref.load %arg2[%c32] : memref<50xf32, #tpu.memory_space<smem>>
      %c33 = arith.constant 33 : index
      %92 = memref.load %arg2[%c33] : memref<50xf32, #tpu.memory_space<smem>>
      %c34_24 = arith.constant 34 : index
      %93 = memref.load %arg2[%c34_24] : memref<50xf32, #tpu.memory_space<smem>>
      %c35 = arith.constant 35 : index
      %94 = memref.load %arg2[%c35] : memref<50xf32, #tpu.memory_space<smem>>
      %c36 = arith.constant 36 : index
      %95 = memref.load %arg2[%c36] : memref<50xf32, #tpu.memory_space<smem>>
      %c37 = arith.constant 37 : index
      %96 = memref.load %arg2[%c37] : memref<50xf32, #tpu.memory_space<smem>>
      %c38 = arith.constant 38 : index
      %97 = memref.load %arg2[%c38] : memref<50xf32, #tpu.memory_space<smem>>
      %c39 = arith.constant 39 : index
      %98 = memref.load %arg2[%c39] : memref<50xf32, #tpu.memory_space<smem>>
      %c40 = arith.constant 40 : index
      %99 = memref.load %arg2[%c40] : memref<50xf32, #tpu.memory_space<smem>>
      %c41 = arith.constant 41 : index
      %100 = memref.load %arg2[%c41] : memref<50xf32, #tpu.memory_space<smem>>
      %c42 = arith.constant 42 : index
      %101 = memref.load %arg2[%c42] : memref<50xf32, #tpu.memory_space<smem>>
      %c43 = arith.constant 43 : index
      %102 = memref.load %arg2[%c43] : memref<50xf32, #tpu.memory_space<smem>>
      %c44 = arith.constant 44 : index
      %103 = memref.load %arg2[%c44] : memref<50xf32, #tpu.memory_space<smem>>
      %c45 = arith.constant 45 : index
      %104 = memref.load %arg2[%c45] : memref<50xf32, #tpu.memory_space<smem>>
      %c46 = arith.constant 46 : index
      %105 = memref.load %arg2[%c46] : memref<50xf32, #tpu.memory_space<smem>>
      %c47 = arith.constant 47 : index
      %106 = memref.load %arg2[%c47] : memref<50xf32, #tpu.memory_space<smem>>
      %c48 = arith.constant 48 : index
      %107 = memref.load %arg2[%c48] : memref<50xf32, #tpu.memory_space<smem>>
      %c49 = arith.constant 49 : index
      %108 = memref.load %arg2[%c49] : memref<50xf32, #tpu.memory_space<smem>>
      %cst_25 = arith.constant 0.000000e+00 : f32
      %109 = vector.broadcast %cst_25 : f32 to vector<2x256xf32>
      %c0_26 = arith.constant 0 : index
      %c0_27 = arith.constant 0 : index
      %c0_28 = arith.constant 0 : index
      %110 = vector.load %arg7[%c0_26, %c0_27, %c0_28] : memref<2x2x324xf32, #tpu.memory_space<vmem>>, vector<1x2x256xf32>
      %111 = vector.shape_cast %110 : vector<1x2x256xf32> to vector<2x256xf32>
      %cst_29 = arith.constant 0.000000e+00 : f32
      %112 = vector.broadcast %cst_29 : f32 to vector<2x256xf32>
      %113 = arith.select %43, %111, %112 : vector<2x256xi1>, vector<2x256xf32>
      %114 = vector.broadcast %59 : f32 to vector<2x256xf32>
      %115 = arith.mulf %114, %113 : vector<2x256xf32>
      %116 = arith.addf %109, %115 : vector<2x256xf32>
      %c0_30 = arith.constant 0 : index
      %c0_31 = arith.constant 0 : index
      %c1_32 = arith.constant 1 : index
      %117 = vector.load %arg7[%c0_30, %c0_31, %c1_32] : memref<2x2x324xf32, #tpu.memory_space<vmem>>, vector<1x2x256xf32>
      %118 = vector.shape_cast %117 : vector<1x2x256xf32> to vector<2x256xf32>
      %cst_33 = arith.constant 0.000000e+00 : f32
      %119 = vector.broadcast %cst_33 : f32 to vector<2x256xf32>
      %120 = arith.select %48, %118, %119 : vector<2x256xi1>, vector<2x256xf32>
      %121 = vector.broadcast %60 : f32 to vector<2x256xf32>
      %122 = arith.mulf %121, %120 : vector<2x256xf32>
      %123 = arith.addf %116, %122 : vector<2x256xf32>
      %c0_34 = arith.constant 0 : index
      %c0_35 = arith.constant 0 : index
      %c2_36 = arith.constant 2 : index
      %124 = vector.load %arg7[%c0_34, %c0_35, %c2_36] : memref<2x2x324xf32, #tpu.memory_space<vmem>>, vector<1x2x256xf32>
      %125 = vector.shape_cast %124 : vector<1x2x256xf32> to vector<2x256xf32>
      %126 = vector.broadcast %61 : f32 to vector<2x256xf32>
      %127 = arith.mulf %126, %125 : vector<2x256xf32>
      %128 = arith.addf %123, %127 : vector<2x256xf32>
      %c0_37 = arith.constant 0 : index
      %c0_38 = arith.constant 0 : index
      %c3_39 = arith.constant 3 : index
      %129 = vector.load %arg7[%c0_37, %c0_38, %c3_39] : memref<2x2x324xf32, #tpu.memory_space<vmem>>, vector<1x2x256xf32>
      %130 = vector.shape_cast %129 : vector<1x2x256xf32> to vector<2x256xf32>
      %cst_40 = arith.constant 0.000000e+00 : f32
      %131 = vector.broadcast %cst_40 : f32 to vector<2x256xf32>
      %132 = arith.select %53, %130, %131 : vector<2x256xi1>, vector<2x256xf32>
      %133 = vector.broadcast %62 : f32 to vector<2x256xf32>
      %134 = arith.mulf %133, %132 : vector<2x256xf32>
      %135 = arith.addf %128, %134 : vector<2x256xf32>
      %c0_41 = arith.constant 0 : index
      %c0_42 = arith.constant 0 : index
      %c4_43 = arith.constant 4 : index
      %136 = vector.load %arg7[%c0_41, %c0_42, %c4_43] : memref<2x2x324xf32, #tpu.memory_space<vmem>>, vector<1x2x256xf32>
      %137 = vector.shape_cast %136 : vector<1x2x256xf32> to vector<2x256xf32>
      %cst_44 = arith.constant 0.000000e+00 : f32
      %138 = vector.broadcast %cst_44 : f32 to vector<2x256xf32>
      %139 = arith.select %58, %137, %138 : vector<2x256xi1>, vector<2x256xf32>
      %140 = vector.broadcast %63 : f32 to vector<2x256xf32>
      %141 = arith.mulf %140, %139 : vector<2x256xf32>
      %142 = arith.addf %135, %141 : vector<2x256xf32>
      %c0_45 = arith.constant 0 : index
      %c0_46 = arith.constant 0 : index
      %c16_47 = arith.constant 16 : index
      %143 = vector.load %arg7[%c0_45, %c0_46, %c16_47] : memref<2x2x324xf32, #tpu.memory_space<vmem>>, vector<1x2x256xf32>
      %144 = vector.shape_cast %143 : vector<1x2x256xf32> to vector<2x256xf32>
      %cst_48 = arith.constant 0.000000e+00 : f32
      %145 = vector.broadcast %cst_48 : f32 to vector<2x256xf32>
      %146 = arith.select %43, %144, %145 : vector<2x256xi1>, vector<2x256xf32>
      %147 = vector.broadcast %64 : f32 to vector<2x256xf32>
      %148 = arith.mulf %147, %146 : vector<2x256xf32>
      %149 = arith.addf %142, %148 : vector<2x256xf32>
      %c0_49 = arith.constant 0 : index
      %c0_50 = arith.constant 0 : index
      %c17_51 = arith.constant 17 : index
      %150 = vector.load %arg7[%c0_49, %c0_50, %c17_51] : memref<2x2x324xf32, #tpu.memory_space<vmem>>, vector<1x2x256xf32>
      %151 = vector.shape_cast %150 : vector<1x2x256xf32> to vector<2x256xf32>
      %cst_52 = arith.constant 0.000000e+00 : f32
      %152 = vector.broadcast %cst_52 : f32 to vector<2x256xf32>
      %153 = arith.select %48, %151, %152 : vector<2x256xi1>, vector<2x256xf32>
      %154 = vector.broadcast %65 : f32 to vector<2x256xf32>
      %155 = arith.mulf %154, %153 : vector<2x256xf32>
      %156 = arith.addf %149, %155 : vector<2x256xf32>
      %c0_53 = arith.constant 0 : index
      %c0_54 = arith.constant 0 : index
      %c18_55 = arith.constant 18 : index
      %157 = vector.load %arg7[%c0_53, %c0_54, %c18_55] : memref<2x2x324xf32, #tpu.memory_space<vmem>>, vector<1x2x256xf32>
      %158 = vector.shape_cast %157 : vector<1x2x256xf32> to vector<2x256xf32>
      %159 = vector.broadcast %66 : f32 to vector<2x256xf32>
      %160 = arith.mulf %159, %158 : vector<2x256xf32>
      %161 = arith.addf %156, %160 : vector<2x256xf32>
      %c0_56 = arith.constant 0 : index
      %c0_57 = arith.constant 0 : index
      %c19_58 = arith.constant 19 : index
      %162 = vector.load %arg7[%c0_56, %c0_57, %c19_58] : memref<2x2x324xf32, #tpu.memory_space<vmem>>, vector<1x2x256xf32>
      %163 = vector.shape_cast %162 : vector<1x2x256xf32> to vector<2x256xf32>
      %cst_59 = arith.constant 0.000000e+00 : f32
      %164 = vector.broadcast %cst_59 : f32 to vector<2x256xf32>
      %165 = arith.select %53, %163, %164 : vector<2x256xi1>, vector<2x256xf32>
      %166 = vector.broadcast %67 : f32 to vector<2x256xf32>
      %167 = arith.mulf %166, %165 : vector<2x256xf32>
      %168 = arith.addf %161, %167 : vector<2x256xf32>
      %c0_60 = arith.constant 0 : index
      %c0_61 = arith.constant 0 : index
      %c20_62 = arith.constant 20 : index
      %169 = vector.load %arg7[%c0_60, %c0_61, %c20_62] : memref<2x2x324xf32, #tpu.memory_space<vmem>>, vector<1x2x256xf32>
      %170 = vector.shape_cast %169 : vector<1x2x256xf32> to vector<2x256xf32>
      %cst_63 = arith.constant 0.000000e+00 : f32
      %171 = vector.broadcast %cst_63 : f32 to vector<2x256xf32>
      %172 = arith.select %58, %170, %171 : vector<2x256xi1>, vector<2x256xf32>
      %173 = vector.broadcast %68 : f32 to vector<2x256xf32>
      %174 = arith.mulf %173, %172 : vector<2x256xf32>
      %175 = arith.addf %168, %174 : vector<2x256xf32>
      %c0_64 = arith.constant 0 : index
      %c0_65 = arith.constant 0 : index
      %c32_66 = arith.constant 32 : index
      %176 = vector.load %arg7[%c0_64, %c0_65, %c32_66] : memref<2x2x324xf32, #tpu.memory_space<vmem>>, vector<1x2x256xf32>
      %177 = vector.shape_cast %176 : vector<1x2x256xf32> to vector<2x256xf32>
      %cst_67 = arith.constant 0.000000e+00 : f32
      %178 = vector.broadcast %cst_67 : f32 to vector<2x256xf32>
      %179 = arith.select %43, %177, %178 : vector<2x256xi1>, vector<2x256xf32>
      %180 = vector.broadcast %69 : f32 to vector<2x256xf32>
      %181 = arith.mulf %180, %179 : vector<2x256xf32>
      %182 = arith.addf %175, %181 : vector<2x256xf32>
      %c0_68 = arith.constant 0 : index
      %c0_69 = arith.constant 0 : index
      %c33_70 = arith.constant 33 : index
      %183 = vector.load %arg7[%c0_68, %c0_69, %c33_70] : memref<2x2x324xf32, #tpu.memory_space<vmem>>, vector<1x2x256xf32>
      %184 = vector.shape_cast %183 : vector<1x2x256xf32> to vector<2x256xf32>
      %cst_71 = arith.constant 0.000000e+00 : f32
      %185 = vector.broadcast %cst_71 : f32 to vector<2x256xf32>
      %186 = arith.select %48, %184, %185 : vector<2x256xi1>, vector<2x256xf32>
      %187 = vector.broadcast %70 : f32 to vector<2x256xf32>
      %188 = arith.mulf %187, %186 : vector<2x256xf32>
      %189 = arith.addf %182, %188 : vector<2x256xf32>
      %c0_72 = arith.constant 0 : index
      %c0_73 = arith.constant 0 : index
      %c34_74 = arith.constant 34 : index
      %190 = vector.load %arg7[%c0_72, %c0_73, %c34_74] : memref<2x2x324xf32, #tpu.memory_space<vmem>>, vector<1x2x256xf32>
      %191 = vector.shape_cast %190 : vector<1x2x256xf32> to vector<2x256xf32>
      %192 = vector.broadcast %71 : f32 to vector<2x256xf32>
      %193 = arith.mulf %192, %191 : vector<2x256xf32>
      %194 = arith.addf %189, %193 : vector<2x256xf32>
      %c0_75 = arith.constant 0 : index
      %c0_76 = arith.constant 0 : index
      %c35_77 = arith.constant 35 : index
      %195 = vector.load %arg7[%c0_75, %c0_76, %c35_77] : memref<2x2x324xf32, #tpu.memory_space<vmem>>, vector<1x2x256xf32>
      %196 = vector.shape_cast %195 : vector<1x2x256xf32> to vector<2x256xf32>
      %cst_78 = arith.constant 0.000000e+00 : f32
      %197 = vector.broadcast %cst_78 : f32 to vector<2x256xf32>
      %198 = arith.select %53, %196, %197 : vector<2x256xi1>, vector<2x256xf32>
      %199 = vector.broadcast %72 : f32 to vector<2x256xf32>
      %200 = arith.mulf %199, %198 : vector<2x256xf32>
      %201 = arith.addf %194, %200 : vector<2x256xf32>
      %c0_79 = arith.constant 0 : index
      %c0_80 = arith.constant 0 : index
      %c36_81 = arith.constant 36 : index
      %202 = vector.load %arg7[%c0_79, %c0_80, %c36_81] : memref<2x2x324xf32, #tpu.memory_space<vmem>>, vector<1x2x256xf32>
      %203 = vector.shape_cast %202 : vector<1x2x256xf32> to vector<2x256xf32>
      %cst_82 = arith.constant 0.000000e+00 : f32
      %204 = vector.broadcast %cst_82 : f32 to vector<2x256xf32>
      %205 = arith.select %58, %203, %204 : vector<2x256xi1>, vector<2x256xf32>
      %206 = vector.broadcast %73 : f32 to vector<2x256xf32>
      %207 = arith.mulf %206, %205 : vector<2x256xf32>
      %208 = arith.addf %201, %207 : vector<2x256xf32>
      %c0_83 = arith.constant 0 : index
      %c0_84 = arith.constant 0 : index
      %c48_85 = arith.constant 48 : index
      %209 = vector.load %arg7[%c0_83, %c0_84, %c48_85] : memref<2x2x324xf32, #tpu.memory_space<vmem>>, vector<1x2x256xf32>
      %210 = vector.shape_cast %209 : vector<1x2x256xf32> to vector<2x256xf32>
      %cst_86 = arith.constant 0.000000e+00 : f32
      %211 = vector.broadcast %cst_86 : f32 to vector<2x256xf32>
      %212 = arith.select %43, %210, %211 : vector<2x256xi1>, vector<2x256xf32>
      %213 = vector.broadcast %74 : f32 to vector<2x256xf32>
      %214 = arith.mulf %213, %212 : vector<2x256xf32>
      %215 = arith.addf %208, %214 : vector<2x256xf32>
      %c0_87 = arith.constant 0 : index
      %c0_88 = arith.constant 0 : index
      %c49_89 = arith.constant 49 : index
      %216 = vector.load %arg7[%c0_87, %c0_88, %c49_89] : memref<2x2x324xf32, #tpu.memory_space<vmem>>, vector<1x2x256xf32>
      %217 = vector.shape_cast %216 : vector<1x2x256xf32> to vector<2x256xf32>
      %cst_90 = arith.constant 0.000000e+00 : f32
      %218 = vector.broadcast %cst_90 : f32 to vector<2x256xf32>
      %219 = arith.select %48, %217, %218 : vector<2x256xi1>, vector<2x256xf32>
      %220 = vector.broadcast %75 : f32 to vector<2x256xf32>
      %221 = arith.mulf %220, %219 : vector<2x256xf32>
      %222 = arith.addf %215, %221 : vector<2x256xf32>
      %c0_91 = arith.constant 0 : index
      %c0_92 = arith.constant 0 : index
      %c50 = arith.constant 50 : index
      %223 = vector.load %arg7[%c0_91, %c0_92, %c50] : memref<2x2x324xf32, #tpu.memory_space<vmem>>, vector<1x2x256xf32>
      %224 = vector.shape_cast %223 : vector<1x2x256xf32> to vector<2x256xf32>
      %225 = vector.broadcast %76 : f32 to vector<2x256xf32>
      %226 = arith.mulf %225, %224 : vector<2x256xf32>
      %227 = arith.addf %222, %226 : vector<2x256xf32>
      %c0_93 = arith.constant 0 : index
      %c0_94 = arith.constant 0 : index
      %c51 = arith.constant 51 : index
      %228 = vector.load %arg7[%c0_93, %c0_94, %c51] : memref<2x2x324xf32, #tpu.memory_space<vmem>>, vector<1x2x256xf32>
      %229 = vector.shape_cast %228 : vector<1x2x256xf32> to vector<2x256xf32>
      %cst_95 = arith.constant 0.000000e+00 : f32
      %230 = vector.broadcast %cst_95 : f32 to vector<2x256xf32>
      %231 = arith.select %53, %229, %230 : vector<2x256xi1>, vector<2x256xf32>
      %232 = vector.broadcast %77 : f32 to vector<2x256xf32>
      %233 = arith.mulf %232, %231 : vector<2x256xf32>
      %234 = arith.addf %227, %233 : vector<2x256xf32>
      %c0_96 = arith.constant 0 : index
      %c0_97 = arith.constant 0 : index
      %c52 = arith.constant 52 : index
      %235 = vector.load %arg7[%c0_96, %c0_97, %c52] : memref<2x2x324xf32, #tpu.memory_space<vmem>>, vector<1x2x256xf32>
      %236 = vector.shape_cast %235 : vector<1x2x256xf32> to vector<2x256xf32>
      %cst_98 = arith.constant 0.000000e+00 : f32
      %237 = vector.broadcast %cst_98 : f32 to vector<2x256xf32>
      %238 = arith.select %58, %236, %237 : vector<2x256xi1>, vector<2x256xf32>
      %239 = vector.broadcast %78 : f32 to vector<2x256xf32>
      %240 = arith.mulf %239, %238 : vector<2x256xf32>
      %241 = arith.addf %234, %240 : vector<2x256xf32>
      %c0_99 = arith.constant 0 : index
      %c0_100 = arith.constant 0 : index
      %c64 = arith.constant 64 : index
      %242 = vector.load %arg7[%c0_99, %c0_100, %c64] : memref<2x2x324xf32, #tpu.memory_space<vmem>>, vector<1x2x256xf32>
      %243 = vector.shape_cast %242 : vector<1x2x256xf32> to vector<2x256xf32>
      %cst_101 = arith.constant 0.000000e+00 : f32
      %244 = vector.broadcast %cst_101 : f32 to vector<2x256xf32>
      %245 = arith.select %43, %243, %244 : vector<2x256xi1>, vector<2x256xf32>
      %246 = vector.broadcast %79 : f32 to vector<2x256xf32>
      %247 = arith.mulf %246, %245 : vector<2x256xf32>
      %248 = arith.addf %241, %247 : vector<2x256xf32>
      %c0_102 = arith.constant 0 : index
      %c0_103 = arith.constant 0 : index
      %c65 = arith.constant 65 : index
      %249 = vector.load %arg7[%c0_102, %c0_103, %c65] : memref<2x2x324xf32, #tpu.memory_space<vmem>>, vector<1x2x256xf32>
      %250 = vector.shape_cast %249 : vector<1x2x256xf32> to vector<2x256xf32>
      %cst_104 = arith.constant 0.000000e+00 : f32
      %251 = vector.broadcast %cst_104 : f32 to vector<2x256xf32>
      %252 = arith.select %48, %250, %251 : vector<2x256xi1>, vector<2x256xf32>
      %253 = vector.broadcast %80 : f32 to vector<2x256xf32>
      %254 = arith.mulf %253, %252 : vector<2x256xf32>
      %255 = arith.addf %248, %254 : vector<2x256xf32>
      %c0_105 = arith.constant 0 : index
      %c0_106 = arith.constant 0 : index
      %c66 = arith.constant 66 : index
      %256 = vector.load %arg7[%c0_105, %c0_106, %c66] : memref<2x2x324xf32, #tpu.memory_space<vmem>>, vector<1x2x256xf32>
      %257 = vector.shape_cast %256 : vector<1x2x256xf32> to vector<2x256xf32>
      %258 = vector.broadcast %81 : f32 to vector<2x256xf32>
      %259 = arith.mulf %258, %257 : vector<2x256xf32>
      %260 = arith.addf %255, %259 : vector<2x256xf32>
      %c0_107 = arith.constant 0 : index
      %c0_108 = arith.constant 0 : index
      %c67 = arith.constant 67 : index
      %261 = vector.load %arg7[%c0_107, %c0_108, %c67] : memref<2x2x324xf32, #tpu.memory_space<vmem>>, vector<1x2x256xf32>
      %262 = vector.shape_cast %261 : vector<1x2x256xf32> to vector<2x256xf32>
      %cst_109 = arith.constant 0.000000e+00 : f32
      %263 = vector.broadcast %cst_109 : f32 to vector<2x256xf32>
      %264 = arith.select %53, %262, %263 : vector<2x256xi1>, vector<2x256xf32>
      %265 = vector.broadcast %82 : f32 to vector<2x256xf32>
      %266 = arith.mulf %265, %264 : vector<2x256xf32>
      %267 = arith.addf %260, %266 : vector<2x256xf32>
      %c0_110 = arith.constant 0 : index
      %c0_111 = arith.constant 0 : index
      %c68 = arith.constant 68 : index
      %268 = vector.load %arg7[%c0_110, %c0_111, %c68] : memref<2x2x324xf32, #tpu.memory_space<vmem>>, vector<1x2x256xf32>
      %269 = vector.shape_cast %268 : vector<1x2x256xf32> to vector<2x256xf32>
      %cst_112 = arith.constant 0.000000e+00 : f32
      %270 = vector.broadcast %cst_112 : f32 to vector<2x256xf32>
      %271 = arith.select %58, %269, %270 : vector<2x256xi1>, vector<2x256xf32>
      %272 = vector.broadcast %83 : f32 to vector<2x256xf32>
      %273 = arith.mulf %272, %271 : vector<2x256xf32>
      %274 = arith.addf %267, %273 : vector<2x256xf32>
      %c1_113 = arith.constant 1 : index
      %c0_114 = arith.constant 0 : index
      %c0_115 = arith.constant 0 : index
      %275 = vector.load %arg7[%c1_113, %c0_114, %c0_115] : memref<2x2x324xf32, #tpu.memory_space<vmem>>, vector<1x2x256xf32>
      %276 = vector.shape_cast %275 : vector<1x2x256xf32> to vector<2x256xf32>
      %cst_116 = arith.constant 0.000000e+00 : f32
      %277 = vector.broadcast %cst_116 : f32 to vector<2x256xf32>
      %278 = arith.select %43, %276, %277 : vector<2x256xi1>, vector<2x256xf32>
      %279 = vector.broadcast %84 : f32 to vector<2x256xf32>
      %280 = arith.mulf %279, %278 : vector<2x256xf32>
      %281 = arith.addf %274, %280 : vector<2x256xf32>
      %c1_117 = arith.constant 1 : index
      %c0_118 = arith.constant 0 : index
      %c1_119 = arith.constant 1 : index
      %282 = vector.load %arg7[%c1_117, %c0_118, %c1_119] : memref<2x2x324xf32, #tpu.memory_space<vmem>>, vector<1x2x256xf32>
      %283 = vector.shape_cast %282 : vector<1x2x256xf32> to vector<2x256xf32>
      %cst_120 = arith.constant 0.000000e+00 : f32
      %284 = vector.broadcast %cst_120 : f32 to vector<2x256xf32>
      %285 = arith.select %48, %283, %284 : vector<2x256xi1>, vector<2x256xf32>
      %286 = vector.broadcast %85 : f32 to vector<2x256xf32>
      %287 = arith.mulf %286, %285 : vector<2x256xf32>
      %288 = arith.addf %281, %287 : vector<2x256xf32>
      %c1_121 = arith.constant 1 : index
      %c0_122 = arith.constant 0 : index
      %c2_123 = arith.constant 2 : index
      %289 = vector.load %arg7[%c1_121, %c0_122, %c2_123] : memref<2x2x324xf32, #tpu.memory_space<vmem>>, vector<1x2x256xf32>
      %290 = vector.shape_cast %289 : vector<1x2x256xf32> to vector<2x256xf32>
      %291 = vector.broadcast %86 : f32 to vector<2x256xf32>
      %292 = arith.mulf %291, %290 : vector<2x256xf32>
      %293 = arith.addf %288, %292 : vector<2x256xf32>
      %c1_124 = arith.constant 1 : index
      %c0_125 = arith.constant 0 : index
      %c3_126 = arith.constant 3 : index
      %294 = vector.load %arg7[%c1_124, %c0_125, %c3_126] : memref<2x2x324xf32, #tpu.memory_space<vmem>>, vector<1x2x256xf32>
      %295 = vector.shape_cast %294 : vector<1x2x256xf32> to vector<2x256xf32>
      %cst_127 = arith.constant 0.000000e+00 : f32
      %296 = vector.broadcast %cst_127 : f32 to vector<2x256xf32>
      %297 = arith.select %53, %295, %296 : vector<2x256xi1>, vector<2x256xf32>
      %298 = vector.broadcast %87 : f32 to vector<2x256xf32>
      %299 = arith.mulf %298, %297 : vector<2x256xf32>
      %300 = arith.addf %293, %299 : vector<2x256xf32>
      %c1_128 = arith.constant 1 : index
      %c0_129 = arith.constant 0 : index
      %c4_130 = arith.constant 4 : index
      %301 = vector.load %arg7[%c1_128, %c0_129, %c4_130] : memref<2x2x324xf32, #tpu.memory_space<vmem>>, vector<1x2x256xf32>
      %302 = vector.shape_cast %301 : vector<1x2x256xf32> to vector<2x256xf32>
      %cst_131 = arith.constant 0.000000e+00 : f32
      %303 = vector.broadcast %cst_131 : f32 to vector<2x256xf32>
      %304 = arith.select %58, %302, %303 : vector<2x256xi1>, vector<2x256xf32>
      %305 = vector.broadcast %88 : f32 to vector<2x256xf32>
      %306 = arith.mulf %305, %304 : vector<2x256xf32>
      %307 = arith.addf %300, %306 : vector<2x256xf32>
      %c1_132 = arith.constant 1 : index
      %c0_133 = arith.constant 0 : index
      %c16_134 = arith.constant 16 : index
      %308 = vector.load %arg7[%c1_132, %c0_133, %c16_134] : memref<2x2x324xf32, #tpu.memory_space<vmem>>, vector<1x2x256xf32>
      %309 = vector.shape_cast %308 : vector<1x2x256xf32> to vector<2x256xf32>
      %cst_135 = arith.constant 0.000000e+00 : f32
      %310 = vector.broadcast %cst_135 : f32 to vector<2x256xf32>
      %311 = arith.select %43, %309, %310 : vector<2x256xi1>, vector<2x256xf32>
      %312 = vector.broadcast %89 : f32 to vector<2x256xf32>
      %313 = arith.mulf %312, %311 : vector<2x256xf32>
      %314 = arith.addf %307, %313 : vector<2x256xf32>
      %c1_136 = arith.constant 1 : index
      %c0_137 = arith.constant 0 : index
      %c17_138 = arith.constant 17 : index
      %315 = vector.load %arg7[%c1_136, %c0_137, %c17_138] : memref<2x2x324xf32, #tpu.memory_space<vmem>>, vector<1x2x256xf32>
      %316 = vector.shape_cast %315 : vector<1x2x256xf32> to vector<2x256xf32>
      %cst_139 = arith.constant 0.000000e+00 : f32
      %317 = vector.broadcast %cst_139 : f32 to vector<2x256xf32>
      %318 = arith.select %48, %316, %317 : vector<2x256xi1>, vector<2x256xf32>
      %319 = vector.broadcast %90 : f32 to vector<2x256xf32>
      %320 = arith.mulf %319, %318 : vector<2x256xf32>
      %321 = arith.addf %314, %320 : vector<2x256xf32>
      %c1_140 = arith.constant 1 : index
      %c0_141 = arith.constant 0 : index
      %c18_142 = arith.constant 18 : index
      %322 = vector.load %arg7[%c1_140, %c0_141, %c18_142] : memref<2x2x324xf32, #tpu.memory_space<vmem>>, vector<1x2x256xf32>
      %323 = vector.shape_cast %322 : vector<1x2x256xf32> to vector<2x256xf32>
      %324 = vector.broadcast %91 : f32 to vector<2x256xf32>
      %325 = arith.mulf %324, %323 : vector<2x256xf32>
      %326 = arith.addf %321, %325 : vector<2x256xf32>
      %c1_143 = arith.constant 1 : index
      %c0_144 = arith.constant 0 : index
      %c19_145 = arith.constant 19 : index
      %327 = vector.load %arg7[%c1_143, %c0_144, %c19_145] : memref<2x2x324xf32, #tpu.memory_space<vmem>>, vector<1x2x256xf32>
      %328 = vector.shape_cast %327 : vector<1x2x256xf32> to vector<2x256xf32>
      %cst_146 = arith.constant 0.000000e+00 : f32
      %329 = vector.broadcast %cst_146 : f32 to vector<2x256xf32>
      %330 = arith.select %53, %328, %329 : vector<2x256xi1>, vector<2x256xf32>
      %331 = vector.broadcast %92 : f32 to vector<2x256xf32>
      %332 = arith.mulf %331, %330 : vector<2x256xf32>
      %333 = arith.addf %326, %332 : vector<2x256xf32>
      %c1_147 = arith.constant 1 : index
      %c0_148 = arith.constant 0 : index
      %c20_149 = arith.constant 20 : index
      %334 = vector.load %arg7[%c1_147, %c0_148, %c20_149] : memref<2x2x324xf32, #tpu.memory_space<vmem>>, vector<1x2x256xf32>
      %335 = vector.shape_cast %334 : vector<1x2x256xf32> to vector<2x256xf32>
      %cst_150 = arith.constant 0.000000e+00 : f32
      %336 = vector.broadcast %cst_150 : f32 to vector<2x256xf32>
      %337 = arith.select %58, %335, %336 : vector<2x256xi1>, vector<2x256xf32>
      %338 = vector.broadcast %93 : f32 to vector<2x256xf32>
      %339 = arith.mulf %338, %337 : vector<2x256xf32>
      %340 = arith.addf %333, %339 : vector<2x256xf32>
      %c1_151 = arith.constant 1 : index
      %c0_152 = arith.constant 0 : index
      %c32_153 = arith.constant 32 : index
      %341 = vector.load %arg7[%c1_151, %c0_152, %c32_153] : memref<2x2x324xf32, #tpu.memory_space<vmem>>, vector<1x2x256xf32>
      %342 = vector.shape_cast %341 : vector<1x2x256xf32> to vector<2x256xf32>
      %cst_154 = arith.constant 0.000000e+00 : f32
      %343 = vector.broadcast %cst_154 : f32 to vector<2x256xf32>
      %344 = arith.select %43, %342, %343 : vector<2x256xi1>, vector<2x256xf32>
      %345 = vector.broadcast %94 : f32 to vector<2x256xf32>
      %346 = arith.mulf %345, %344 : vector<2x256xf32>
      %347 = arith.addf %340, %346 : vector<2x256xf32>
      %c1_155 = arith.constant 1 : index
      %c0_156 = arith.constant 0 : index
      %c33_157 = arith.constant 33 : index
      %348 = vector.load %arg7[%c1_155, %c0_156, %c33_157] : memref<2x2x324xf32, #tpu.memory_space<vmem>>, vector<1x2x256xf32>
      %349 = vector.shape_cast %348 : vector<1x2x256xf32> to vector<2x256xf32>
      %cst_158 = arith.constant 0.000000e+00 : f32
      %350 = vector.broadcast %cst_158 : f32 to vector<2x256xf32>
      %351 = arith.select %48, %349, %350 : vector<2x256xi1>, vector<2x256xf32>
      %352 = vector.broadcast %95 : f32 to vector<2x256xf32>
      %353 = arith.mulf %352, %351 : vector<2x256xf32>
      %354 = arith.addf %347, %353 : vector<2x256xf32>
      %c1_159 = arith.constant 1 : index
      %c0_160 = arith.constant 0 : index
      %c34_161 = arith.constant 34 : index
      %355 = vector.load %arg7[%c1_159, %c0_160, %c34_161] : memref<2x2x324xf32, #tpu.memory_space<vmem>>, vector<1x2x256xf32>
      %356 = vector.shape_cast %355 : vector<1x2x256xf32> to vector<2x256xf32>
      %357 = vector.broadcast %96 : f32 to vector<2x256xf32>
      %358 = arith.mulf %357, %356 : vector<2x256xf32>
      %359 = arith.addf %354, %358 : vector<2x256xf32>
      %c1_162 = arith.constant 1 : index
      %c0_163 = arith.constant 0 : index
      %c35_164 = arith.constant 35 : index
      %360 = vector.load %arg7[%c1_162, %c0_163, %c35_164] : memref<2x2x324xf32, #tpu.memory_space<vmem>>, vector<1x2x256xf32>
      %361 = vector.shape_cast %360 : vector<1x2x256xf32> to vector<2x256xf32>
      %cst_165 = arith.constant 0.000000e+00 : f32
      %362 = vector.broadcast %cst_165 : f32 to vector<2x256xf32>
      %363 = arith.select %53, %361, %362 : vector<2x256xi1>, vector<2x256xf32>
      %364 = vector.broadcast %97 : f32 to vector<2x256xf32>
      %365 = arith.mulf %364, %363 : vector<2x256xf32>
      %366 = arith.addf %359, %365 : vector<2x256xf32>
      %c1_166 = arith.constant 1 : index
      %c0_167 = arith.constant 0 : index
      %c36_168 = arith.constant 36 : index
      %367 = vector.load %arg7[%c1_166, %c0_167, %c36_168] : memref<2x2x324xf32, #tpu.memory_space<vmem>>, vector<1x2x256xf32>
      %368 = vector.shape_cast %367 : vector<1x2x256xf32> to vector<2x256xf32>
      %cst_169 = arith.constant 0.000000e+00 : f32
      %369 = vector.broadcast %cst_169 : f32 to vector<2x256xf32>
      %370 = arith.select %58, %368, %369 : vector<2x256xi1>, vector<2x256xf32>
      %371 = vector.broadcast %98 : f32 to vector<2x256xf32>
      %372 = arith.mulf %371, %370 : vector<2x256xf32>
      %373 = arith.addf %366, %372 : vector<2x256xf32>
      %c1_170 = arith.constant 1 : index
      %c0_171 = arith.constant 0 : index
      %c48_172 = arith.constant 48 : index
      %374 = vector.load %arg7[%c1_170, %c0_171, %c48_172] : memref<2x2x324xf32, #tpu.memory_space<vmem>>, vector<1x2x256xf32>
      %375 = vector.shape_cast %374 : vector<1x2x256xf32> to vector<2x256xf32>
      %cst_173 = arith.constant 0.000000e+00 : f32
      %376 = vector.broadcast %cst_173 : f32 to vector<2x256xf32>
      %377 = arith.select %43, %375, %376 : vector<2x256xi1>, vector<2x256xf32>
      %378 = vector.broadcast %99 : f32 to vector<2x256xf32>
      %379 = arith.mulf %378, %377 : vector<2x256xf32>
      %380 = arith.addf %373, %379 : vector<2x256xf32>
      %c1_174 = arith.constant 1 : index
      %c0_175 = arith.constant 0 : index
      %c49_176 = arith.constant 49 : index
      %381 = vector.load %arg7[%c1_174, %c0_175, %c49_176] : memref<2x2x324xf32, #tpu.memory_space<vmem>>, vector<1x2x256xf32>
      %382 = vector.shape_cast %381 : vector<1x2x256xf32> to vector<2x256xf32>
      %cst_177 = arith.constant 0.000000e+00 : f32
      %383 = vector.broadcast %cst_177 : f32 to vector<2x256xf32>
      %384 = arith.select %48, %382, %383 : vector<2x256xi1>, vector<2x256xf32>
      %385 = vector.broadcast %100 : f32 to vector<2x256xf32>
      %386 = arith.mulf %385, %384 : vector<2x256xf32>
      %387 = arith.addf %380, %386 : vector<2x256xf32>
      %c1_178 = arith.constant 1 : index
      %c0_179 = arith.constant 0 : index
      %c50_180 = arith.constant 50 : index
      %388 = vector.load %arg7[%c1_178, %c0_179, %c50_180] : memref<2x2x324xf32, #tpu.memory_space<vmem>>, vector<1x2x256xf32>
      %389 = vector.shape_cast %388 : vector<1x2x256xf32> to vector<2x256xf32>
      %390 = vector.broadcast %101 : f32 to vector<2x256xf32>
      %391 = arith.mulf %390, %389 : vector<2x256xf32>
      %392 = arith.addf %387, %391 : vector<2x256xf32>
      %c1_181 = arith.constant 1 : index
      %c0_182 = arith.constant 0 : index
      %c51_183 = arith.constant 51 : index
      %393 = vector.load %arg7[%c1_181, %c0_182, %c51_183] : memref<2x2x324xf32, #tpu.memory_space<vmem>>, vector<1x2x256xf32>
      %394 = vector.shape_cast %393 : vector<1x2x256xf32> to vector<2x256xf32>
      %cst_184 = arith.constant 0.000000e+00 : f32
      %395 = vector.broadcast %cst_184 : f32 to vector<2x256xf32>
      %396 = arith.select %53, %394, %395 : vector<2x256xi1>, vector<2x256xf32>
      %397 = vector.broadcast %102 : f32 to vector<2x256xf32>
      %398 = arith.mulf %397, %396 : vector<2x256xf32>
      %399 = arith.addf %392, %398 : vector<2x256xf32>
      %c1_185 = arith.constant 1 : index
      %c0_186 = arith.constant 0 : index
      %c52_187 = arith.constant 52 : index
      %400 = vector.load %arg7[%c1_185, %c0_186, %c52_187] : memref<2x2x324xf32, #tpu.memory_space<vmem>>, vector<1x2x256xf32>
      %401 = vector.shape_cast %400 : vector<1x2x256xf32> to vector<2x256xf32>
      %cst_188 = arith.constant 0.000000e+00 : f32
      %402 = vector.broadcast %cst_188 : f32 to vector<2x256xf32>
      %403 = arith.select %58, %401, %402 : vector<2x256xi1>, vector<2x256xf32>
      %404 = vector.broadcast %103 : f32 to vector<2x256xf32>
      %405 = arith.mulf %404, %403 : vector<2x256xf32>
      %406 = arith.addf %399, %405 : vector<2x256xf32>
      %c1_189 = arith.constant 1 : index
      %c0_190 = arith.constant 0 : index
      %c64_191 = arith.constant 64 : index
      %407 = vector.load %arg7[%c1_189, %c0_190, %c64_191] : memref<2x2x324xf32, #tpu.memory_space<vmem>>, vector<1x2x256xf32>
      %408 = vector.shape_cast %407 : vector<1x2x256xf32> to vector<2x256xf32>
      %cst_192 = arith.constant 0.000000e+00 : f32
      %409 = vector.broadcast %cst_192 : f32 to vector<2x256xf32>
      %410 = arith.select %43, %408, %409 : vector<2x256xi1>, vector<2x256xf32>
      %411 = vector.broadcast %104 : f32 to vector<2x256xf32>
      %412 = arith.mulf %411, %410 : vector<2x256xf32>
      %413 = arith.addf %406, %412 : vector<2x256xf32>
      %c1_193 = arith.constant 1 : index
      %c0_194 = arith.constant 0 : index
      %c65_195 = arith.constant 65 : index
      %414 = vector.load %arg7[%c1_193, %c0_194, %c65_195] : memref<2x2x324xf32, #tpu.memory_space<vmem>>, vector<1x2x256xf32>
      %415 = vector.shape_cast %414 : vector<1x2x256xf32> to vector<2x256xf32>
      %cst_196 = arith.constant 0.000000e+00 : f32
      %416 = vector.broadcast %cst_196 : f32 to vector<2x256xf32>
      %417 = arith.select %48, %415, %416 : vector<2x256xi1>, vector<2x256xf32>
      %418 = vector.broadcast %105 : f32 to vector<2x256xf32>
      %419 = arith.mulf %418, %417 : vector<2x256xf32>
      %420 = arith.addf %413, %419 : vector<2x256xf32>
      %c1_197 = arith.constant 1 : index
      %c0_198 = arith.constant 0 : index
      %c66_199 = arith.constant 66 : index
      %421 = vector.load %arg7[%c1_197, %c0_198, %c66_199] : memref<2x2x324xf32, #tpu.memory_space<vmem>>, vector<1x2x256xf32>
      %422 = vector.shape_cast %421 : vector<1x2x256xf32> to vector<2x256xf32>
      %423 = vector.broadcast %106 : f32 to vector<2x256xf32>
      %424 = arith.mulf %423, %422 : vector<2x256xf32>
      %425 = arith.addf %420, %424 : vector<2x256xf32>
      %c1_200 = arith.constant 1 : index
      %c0_201 = arith.constant 0 : index
      %c67_202 = arith.constant 67 : index
      %426 = vector.load %arg7[%c1_200, %c0_201, %c67_202] : memref<2x2x324xf32, #tpu.memory_space<vmem>>, vector<1x2x256xf32>
      %427 = vector.shape_cast %426 : vector<1x2x256xf32> to vector<2x256xf32>
      %cst_203 = arith.constant 0.000000e+00 : f32
      %428 = vector.broadcast %cst_203 : f32 to vector<2x256xf32>
      %429 = arith.select %53, %427, %428 : vector<2x256xi1>, vector<2x256xf32>
      %430 = vector.broadcast %107 : f32 to vector<2x256xf32>
      %431 = arith.mulf %430, %429 : vector<2x256xf32>
      %432 = arith.addf %425, %431 : vector<2x256xf32>
      %c1_204 = arith.constant 1 : index
      %c0_205 = arith.constant 0 : index
      %c68_206 = arith.constant 68 : index
      %433 = vector.load %arg7[%c1_204, %c0_205, %c68_206] : memref<2x2x324xf32, #tpu.memory_space<vmem>>, vector<1x2x256xf32>
      %434 = vector.shape_cast %433 : vector<1x2x256xf32> to vector<2x256xf32>
      %cst_207 = arith.constant 0.000000e+00 : f32
      %435 = vector.broadcast %cst_207 : f32 to vector<2x256xf32>
      %436 = arith.select %58, %434, %435 : vector<2x256xi1>, vector<2x256xf32>
      %437 = vector.broadcast %108 : f32 to vector<2x256xf32>
      %438 = arith.mulf %437, %436 : vector<2x256xf32>
      %439 = arith.addf %432, %438 : vector<2x256xf32>
      %440 = arith.negf %439 : vector<2x256xf32>
      %441 = math.exp %440 : vector<2x256xf32>
      %cst_208 = arith.constant 1.000000e+00 : f32
      %442 = vector.broadcast %cst_208 : f32 to vector<2x256xf32>
      %443 = arith.addf %442, %441 : vector<2x256xf32>
      %444 = arith.divf %442, %443 : vector<2x256xf32>
      %c0_209 = arith.constant 0 : index
      %c0_210 = arith.constant 0 : index
      %c0_211 = arith.constant 0 : index
      %445 = vector.load %arg4[%c0_209, %c0_210, %c0_211] : memref<2x1x256xf32, #tpu.memory_space<vmem>>, vector<2x1x256xf32>
      %446 = vector.shape_cast %445 : vector<2x1x256xf32> to vector<2x256xf32>
      %447 = vector.shape_cast %444 : vector<2x256xf32> to vector<2x1x256xf32>
      tpu.vector_store %arg4[%c0_209, %c0_210, %c0_211], %447 {strides = array<i32>} : memref<2x1x256xf32, #tpu.memory_space<vmem>>, vector<2x1x256xf32>,
    } else {
    }
    return
  }
  func.func @transform_0(%arg0: i32, %arg1: i32) -> i32 {
    %c0_i32 = arith.constant 0 : i32
    %c0_i32_0 = arith.constant 0 : i32
    return %c0_i32 : i32
  }
  func.func @transform_1(%arg0: i32, %arg1: i32) -> (i32, i32, i32) {
    %c0_i32 = arith.constant 0 : i32
    %c0_i32_0 = arith.constant 0 : i32
    return %arg0, %arg1, %c0_i32 : i32, i32, i32
  }
  func.func @transform_2(%arg0: i32, %arg1: i32) -> (i32, i32, i32) {
    %c0_i32 = arith.constant 0 : i32
    %c0_i32_0 = arith.constant 0 : i32
    %c0_i32_1 = arith.constant 0 : i32
    return %arg0, %c0_i32, %c0_i32_0 : i32, i32, i32
  }
}

</mosaic_0001>

<bundles_post_ra>
// kernel: tpu_custom_call.1
= control target key start
LH: loop header
LB: loop body
LE: loop exit
PB: predicated region body
PF: predicated region fallthrough
CT: control target
= control target key end

     0   :  { %7 = vsyncpa [#allocation8], 0  ;;  %s2828_s0 = inlined_call_operand.hbm [shape: f32[50], index: 0, kind: input, shape index: {}]   ;;  %s2829_s1 = inlined_call_operand.hbm [shape: f32[2,4,256], index: 1, kind: input, shape index: {}]   ;;  %s2830_s2 = inlined_call_operand.hbm [shape: f32[2,1,256], index: 2, kind: output, shape index: {}]  }
   0x1   :  { %8 = vsyncpa [#allocation6], 0 }
   0x2   :  { %9 = vsyncpa [#allocation7], 0  ;;  %s1647_s9 = smov [#allocation5]   ;;  %s1648_s12 = smov [#allocation9]  }
   0x3   :  { %17 = dma.hbm_to_smem %s2828_s0, 16, %s1647_s9, [#allocation8]  }
   0x4   :  { %s23_s13 = sshll.u32 %s1648_s12, 4  ;;  %s24_s13 = int_to_ptr.vmem [resolvable:$true] %s23_s13 }
   0x5   :  { %s1609_s14 = scalar_lea.vmem %s24_s13, 256  ;;  %p1614_p1 = scmp.lt.s32.totalorder %s24_s13, %s24_s13 }
   0x6   :  { %p1610_p0 = scmp.ne.s32.totalorder %s24_s13, %s1609_s14  ;;  %p1615_p2 = scmp.lt.s32.totalorder %s1609_s14, %s1609_s14 }
   0x8   :  { %p1616_p3 = por %p1615_p2, %p1614_p1 }
   0xa   :  { %p1617_p4 = pnand %p1616_p3, %p1610_p0 }
   0xc   :  { %1620 = shalt.err (!%p1617_p4)
}
   0xd   :  { %s1649_s15 = smov 128   ;;  %s1650_s16 = smov 8  }
   0xe   :  { %29 = dma.hbm_to_vmem [thread:$0]  %s2829_s1, 256, %s24_s13, [#allocation6], %s1649_s15, %s1649_s15, %s1650_s16  }
   0xf   :  { %1641 = dma.done.wait [#allocation8], 16  }
  0x10   :  { %1642 = vsyncadd [#allocation8], 4294967280 }
  0x11   :  { %1643 = dma.done.wait [#allocation6], 256  }
  0x12   :  { %1644 = vsyncadd [#allocation6], 4294967040 }
  0x13   :  { %36 = sfence }
  0x14   :  { %v37_v0 = vld [vmem:[#allocation9] sm:$0xff]  ;;  %v38_v1 = vld [vmem:[#allocation9 + $0x8] sm:$0xff]  ;;  %vm45_vm0 = vcmask 1043456   ;;  %v2831_v2 = vlaneseq  ;;  %v1651_v9 = vmov 1983009808   ;;  %vm170_vm1 = vcmask 271360  }
  0x15   :  { %v41_v3 = vcombine.high %v37_v0, %v37_v0  ;;  %v42_v4 = vcombine.high %v38_v1, %v38_v1  ;;  %v74_v5 = vsel %vm45_vm0, %v37_v0, -inf  ;;  %v88_v6 = vsel %vm45_vm0, %v38_v1, -inf  ;;  %s1653_s0 = smov 34   ;;  %s1654_s1 = smov 125  }
  0x16   :  { %v75_v7 = vrot.slane %v74_v5, 4  ;;  %v89_v8 = vrot.slane %v88_v6, 4  ;;  %v112_v10 = vunpack.c.l.s4 %v1651_v9  ;;  %v1708_v13 = vshrl.u32 %v2831_v2, 7  ;;  %s1655_s19 = smov 127   ;;  %s1656_s20 = smov 124  }
  0x17   :  { %v81_v11 = vsel %vm45_vm0, %v41_v3, -inf  ;;  %v95_v12 = vsel %vm45_vm0, %v42_v4, -inf  ;;  %v46_v19 = vsel %vm45_vm0, %v37_v0, 0.0  ;;  %v53_v20 = vsel %vm45_vm0, %v41_v3, 0.0  ;;  %s1657_s21 = smov 112   ;;  %s1658_s22 = smov 108  }
  0x18   :  { %2860 = vst [vmem:[#allocation14_spill] sm:$0xff] %v1708_v13  ;;  %v76_v14 = vmax.f32 %v74_v5, %v75_v7  ;;  %v82_v15 = vrot.slane %v81_v11, 4  ;;  %v90_v16 = vmax.f32 %v88_v6, %v89_v8  ;;  %v96_v17 = vrot.slane %v95_v12, 4  ;;  %s1659_s23 = smov 111   ;;  %s1660_s24 = smov 95  }
  0x19   :  { %v113_v18 = vunpack.c.0.s8 %v112_v10  ;;  %v47_v26 = vrot.slane %v46_v19, 4  ;;  %v54_v27 = vrot.slane %v53_v20, 4  ;;  %v60_v28 = vsel %vm45_vm0, %v38_v1, 0.0  ;;  %s1661_s25 = smov 109   ;;  %s1662_s26 = smov 93  }
  0x1a   :  { %v77_v21 = vrot.slane %v76_v14, 2  ;;  %v83_v22 = vmax.f32 %v81_v11, %v82_v15  ;;  %v91_v23 = vrot.slane %v90_v16, 2  ;;  %v97_v24 = vmax.f32 %v95_v12, %v96_v17  ;;  %s1663_s27 = smov 96   ;;  %s1664_s28 = smov 80  }
  0x1b   :  { %v1713_v25 = vsub.s32 %v113_v18, %v1708_v13  ;;  %v48_v33 = vadd.f32 %v47_v26, %v46_v19  ;;  %v55_v34 = vadd.f32 %v54_v27, %v53_v20  ;;  %v61_v35 = vrot.slane %v60_v28, 4  ;;  %s1665_s29 = smov 92   ;;  %s1666_s30 = smov 76  }
  0x1c   :  { %v78_v29 = vmax.f32 %v76_v14, %v77_v21  ;;  %v84_v30 = vrot.slane %v83_v22, 2  ;;  %v92_v31 = vmax.f32 %v90_v16, %v91_v23  ;;  %v98_v32 = vrot.slane %v97_v24, 2  ;;  %s1667_s3 = smov 79   ;;  %s1519_s4 = sld [smem:[#allocation5 + $0x1b]] }
  0x1d   :  { %v67_v36 = vsel %vm45_vm0, %v42_v4, 0.0  ;;  %v49_v41 = vrot.slane %v48_v33, 2  ;;  %v56_v42 = vrot.slane %v55_v34, 2  ;;  %v62_v43 = vadd.f32 %v61_v35, %v60_v28  ;;  %s1668_s5 = smov 63   ;;  %s1669_s6 = smov 77  }
  0x1e   :  { %v79_v37 = vrot.slane %v78_v29, 1  ;;  %v85_v38 = vmax.f32 %v83_v22, %v84_v30  ;;  %v93_v39 = vrot.slane %v92_v31, 1  ;;  %v99_v40 = vmax.f32 %v97_v24, %v98_v32  ;;  %s1670_s7 = smov 61   ;;  %s1671_s8 = smov 64  }
  0x1f   :  { %v68_v44 = vrot.slane %v67_v36, 4  ;;  %v50_v49 = vadd.f32 %v49_v41, %v48_v33  ;;  %v57_v50 = vadd.f32 %v56_v42, %v55_v34  ;;  %v63_v51 = vrot.slane %v62_v43, 2  ;;  %s1672_s9 = smov 60   ;;  %s1494_s10 = sld [smem:[#allocation5 + $0x2]] }
  0x20   :  { %v80_v45 = vmax.f32 %v78_v29, %v79_v37  ;;  %v86_v46 = vrot.slane %v85_v38, 1  ;;  %v94_v47 = vmax.f32 %v92_v31, %v93_v39  ;;  %v100_v48 = vrot.slane %v99_v40, 1  ;;  %s1673_s11 = smov 126   ;;  %s1499_s12 = sld [smem:[#allocation5 + $0x7]] }
  0x21   :  { %v69_v52 = vadd.f32 %v68_v44, %v67_v36  ;;  %v51_v55 = vrot.slane %v50_v49, 1  ;;  %v58_v56 = vrot.slane %v57_v50, 1  ;;  %v64_v57 = vadd.f32 %v63_v51, %v62_v43  ;;  %s1674_s13 = smov 110   ;;  %s1504_s14 = sld [smem:[#allocation5 + $0xc]] }
  0x22   :  { %v87_v53 = vmax.f32 %v85_v38, %v86_v46  ;;  %v101_v54 = vmax.f32 %v99_v40, %v100_v48  ;;  %v1652_v59 = vmov 0.0   ;;  %vm173_vm2 = vcmask 550160   ;;  %s1509_s15 = sld [smem:[#allocation5 + $0x11]]  ;;  %s1675_s16 = smov 94  }
  0x23   :  { %v70_v58 = vrot.slane %v69_v52, 2  ;;  %172 = vst.msk [vmem:[#allocation4 + $0x6] sm:$0x3] %vm170_vm1, %v1652_v59  ;;  %171 = vst.msk [vmem:[#allocation4] sm:$0x3] %vm170_vm1, %v1652_v59  ;;  %v52_v62 = vadd.f32 %v51_v55, %v50_v49  ;;  %v59_v63 = vadd.f32 %v58_v56, %v57_v50  ;;  %v65_v0 = vrot.slane %v64_v57, 1 }
  0x24   :  { %v145_v60 = vcombine.low %v80_v45, %v87_v53  ;;  %v153_v61 = vcombine.low %v94_v47, %v101_v54  ;;  %175 = vst.msk [vmem:[#allocation4 + $0xa] sm:$0x3] %vm173_vm2, %v1652_v59  ;;  %174 = vst.msk [vmem:[#allocation4 + $0x4] sm:$0x3] %vm173_vm2, %v1652_v59  ;;  %vm131_vm3 = vcmask 1041409   ;;  %vm133_vm4 = vcmask 1043459  }
  0x25   :  { %v71_v1 = vadd.f32 %v70_v58, %v69_v52  ;;  %v66_v5 = vadd.f32 %v65_v0, %v64_v57  ;;  %vm135_vm5 = vcmask 1045509   ;;  %v110_v9 = vcombine.low %v52_v62, %v59_v63  ;;  %s1676_s17 = smov 78   ;;  %s1514_s18 = sld [smem:[#allocation5 + $0x16]] }
  0x26   :  { %v152_v3 = vrot.slane %v145_v60, %v1713_v25  ;;  %v160_v4 = vrot.slane %v153_v61, %v1713_v25  ;;  %vm137_vm6 = vcmask 1047559   ;;  %vm260_vm7 = vcmask 1041680  }
  0x27   :  { %v72_v6 = vrot.slane %v71_v1, 1  ;;  %v117_v16 = vrot.slane %v110_v9, %v1713_v25  ;;  %vm261_vm8 = vcmask 1043458   ;;  %vm263_vm10 = vcmask 275460  }
  0x28   :  { %v163_v7 = vrot.slane %v160_v4, 7  ;;  %vm262_vm9 = vmor %vm261_vm8, %vm260_vm7  ;;  %vm257_vm11 = vcmask 277504   ;;  %v969_v39 = vstv %s1519_s4  ;;  %v431_v44 = vstv %s1494_s10  ;;  %s2355_s4 = sld [smem:[#allocation5 + $0xe]] }
  0x29   :  { %v73_v8 = vadd.f32 %v72_v6, %v71_v1  ;;  %vm264_vm12 = vmor %vm263_vm10, %vm262_vm9  ;;  %v535_v49 = vstv %s1499_s12  ;;  %v639_v52 = vstv %s1504_s14  ;;  %v743_v55 = vstv %s1509_s15  ;;  %s2437_s10 = sld [smem:[#allocation5 + $0x13]] }
  0x2a   :  { %v164_v10 = vsel %vm131_vm3, %v163_v7, %v152_v3  ;;  %vm2857_vm13 = vcmask 777216   ;;  %vm2850_vm14 = vcmask 760832   ;;  %vm2849_vm15 = vcmask 752640   ;;  %s2480_s12 = sld [smem:[#allocation5 + $0x15]] }
  0x2b   :  { %v165_v11 = vsel %vm133_vm4, %v163_v7, %v164_v10  ;;  %v118_v12 = vcombine.low %v66_v5, %v73_v8  ;;  %v847_v1 = vstv %s1514_s18  ;;  %vm2847_vm0 = vcmask 654336   ;;  %s2516_s14 = sld [smem:[#allocation5 + $0x18]] }
  0x2c   :  { %v166_v14 = vsel %vm135_vm5, %v163_v7, %v165_v11  ;;  %vm2846_vm1 = vcmask 646144   ;;  %vm2845_vm2 = vcmask 629760   ;;  %vm2843_vm8 = vcmask 1039360   ;;  %s2524_s15 = sld [smem:[#allocation5 + $0x1a]] }
  0x2d   :  { %v167_v15 = vsel %vm137_vm6, %v163_v7, %v166_v14  ;;  %v125_v17 = vrot.slane %v118_v12, %v1713_v25  ;;  %vm2844_vm9 = vcmask 498688   ;;  %s2584_s18 = sld [smem:[#allocation5 + $0x1e]] }
  0x2e   :  { %169 = vst [vmem:[#allocation3] sm:$0xf] %v167_v15 }
  0x2f   :  { %v130_v18 = vrot.slane %v125_v17, 7 }
  0x31   :  { %v132_v19 = vsel %vm131_vm3, %v130_v18, %v117_v16  ;;  %vm2842_vm3 = vcmask 621568  }
  0x32   :  { %v134_v20 = vsel %vm133_vm4, %v130_v18, %v132_v19  ;;  %vm2841_vm4 = vcmask 523264  }
  0x33   :  { %v136_v21 = vsel %vm135_vm5, %v130_v18, %v134_v20  ;;  %vm2840_vm5 = vcmask 515072  }
  0x34   :  { %v138_v22 = vsel %vm137_vm6, %v130_v18, %v136_v21 }
  0x35   :  { %v266_v23 = vld [vmem:[#allocation3] sm:$0xf]  ;;  %140 = vst [vmem:[#allocation2] sm:$0xf] %v138_v22 }
  0x36   :  { %268 = vrot.lane.b32.xlu0 %v266_v23, %s1653_s0 }
  0x3c   :  { %v251_v24 = vld [vmem:[#allocation2] sm:$0xf] }
  0x3d   :  { %v252_v26 = vmul.f32 0.25, %v251_v24 }
  0x3f   :  { %254 = vrot.lane.b32.xlu0 %v252_v26, %s1653_s0  ;;  %s1677_s0 = smov 62  }
  0xa8   :  { %v269_v27 = vpop.permute.xlu0 %268 }
  0xa9   :  { %v270_v28 = vrot.slane %v269_v27, 6 }
  0xab   :  { %v271_v29 = vsel %vm257_vm11, %v270_v28, %v269_v27 }
  0xac   :  { %274 = vst.msk [vmem:[#allocation4 + $0x6] sm:$0x3f] %vm264_vm12, %v271_v29 }
  0xb1   :  { %v255_v30 = vpop.permute.xlu0 %254 }
  0xb2   :  { %v256_v31 = vrot.slane %v255_v30, 6 }
  0xb3   :  { %v1725_v32 = vld [vmem:[#allocation4 + $0x6] sm:$0x3f] }
  0xb4   :  { %v1729_v33 = vrot.slane %v1725_v32, %v1713_v25  ;;  %v258_v34 = vsel %vm257_vm11, %v256_v31, %v255_v30  ;;  %v936_v37 = vcombine.high %v1725_v32, %v1725_v32  ;;  %v1772_v41 = vmul.f32 %v969_v39, %v1725_v32 }
  0xb5   :  { %265 = vst.msk [vmem:[#allocation4] sm:$0x3f] %vm264_vm12, %v258_v34  ;;  %vm2859_vm12 = vcmask 1022976  }
  0xb6   :  { %1000 = vrot.lane.b32.xlu1 %v1729_v33, %s1654_s1  ;;  %952 = vrot.lane.b32.xlu0 %v1729_v33, %s1655_s19  ;;  %v1762_v38 = vrot.slane %v936_v37, %v1713_v25  ;;  %v1769_v40 = vcombine.high %v1729_v33, %v1729_v33  ;;  %v1780_v42 = vrot.slane %v1772_v41, %v1713_v25 }
  0xb7   :  { %v972_v11 = vcombine.high %v1772_v41, %v1772_v41 }
  0xb8   :  { %v987_v19 = vcombine.high %v1780_v42, %v1780_v42 }
  0xb9   :  { %v986_v14 = vrot.slane %v972_v11, %v1713_v25 }
  0xba   :  { %1017 = vrot.lane.b32.xlu1 %v1729_v33, %s1656_s20 }
  0xbc   :  { %v1737_v35 = vld [vmem:[#allocation4] sm:$0x3f] }
  0xbd   :  { %v404_v36 = vrot.slane %v1737_v35, %v1713_v25  ;;  %v397_v43 = vcombine.high %v1737_v35, %v1737_v35  ;;  %v1798_v47 = vmul.f32 %v431_v44, %v1737_v35  ;;  %v1821_v50 = vmul.f32 %v535_v49, %v1737_v35 }
  0xbe   :  { %v1848_v53 = vmul.f32 %v639_v52, %v1737_v35  ;;  %v1871_v56 = vmul.f32 %v743_v55, %v1737_v35  ;;  %v848_v5 = vmul.f32 %v847_v1, %v1737_v35 }
  0xbf   :  { %463 = vrot.lane.b32.xlu0 %v404_v36, %s1654_s1  ;;  %413 = vrot.lane.b32.xlu1 %v404_v36, %s1655_s19  ;;  %v1793_v45 = vrot.slane %v397_v43, %v1713_v25  ;;  %v1795_v46 = vcombine.high %v404_v36, %v404_v36  ;;  %v1806_v48 = vrot.slane %v1798_v47, %v1713_v25 }
  0xc0   :  { %v1829_v51 = vrot.slane %v1821_v50, %v1713_v25  ;;  %v1856_v54 = vrot.slane %v1848_v53, %v1713_v25  ;;  %v1881_v58 = vrot.slane %v1871_v56, %v1713_v25  ;;  %v857_v8 = vrot.slane %v848_v5, %v1713_v25 }
  0xc1   :  { %v449_v17 = vcombine.high %v1806_v48, %v1806_v48  ;;  %v538_v20 = vcombine.high %v1821_v50, %v1821_v50  ;;  %v434_v21 = vcombine.high %v1798_v47, %v1798_v47  ;;  %v746_v31 = vcombine.high %v1871_v56, %v1871_v56 }
  0xc2   :  { %v657_v28 = vcombine.high %v1856_v54, %v1856_v54  ;;  %v553_v30 = vcombine.high %v1829_v51, %v1829_v51  ;;  %v642_v34 = vcombine.high %v1848_v53, %v1848_v53  ;;  %v761_v44 = vcombine.high %v1881_v58, %v1881_v58 }
  0xc3   :  { %499 = vrot.lane.b32.xlu0 %v404_v36, %s1657_s21  ;;  %481 = vrot.lane.b32.xlu1 %v404_v36, %s1656_s20  ;;  %v552_v23 = vrot.slane %v538_v20, %v1713_v25  ;;  %v448_v26 = vrot.slane %v434_v21, %v1713_v25 }
  0xc4   :  { %v656_v39 = vrot.slane %v642_v34, %v1713_v25 }
  0xc7   :  { %585 = vrot.lane.b32.xlu0 %v404_v36, %s1658_s22  ;;  %517 = vrot.lane.b32.xlu1 %v404_v36, %s1659_s23 }
  0xcb   :  { %621 = vrot.lane.b32.xlu0 %v404_v36, %s1660_s24  ;;  %567 = vrot.lane.b32.xlu1 %v404_v36, %s1661_s25 }
  0xcf   :  { %671 = vrot.lane.b32.xlu0 %v404_v36, %s1662_s26  ;;  %603 = vrot.lane.b32.xlu1 %v404_v36, %s1663_s27 }
  0xd3   :  { %707 = vrot.lane.b32.xlu0 %v404_v36, %s1664_s28  ;;  %689 = vrot.lane.b32.xlu1 %v404_v36, %s1665_s29 }
  0xd7   :  { %793 = vrot.lane.b32.xlu0 %v404_v36, %s1666_s30  ;;  %725 = vrot.lane.b32.xlu1 %v404_v36, %s1667_s3 }
  0xdb   :  { %829 = vrot.lane.b32.xlu0 %v404_v36, %s1668_s5  ;;  %775 = vrot.lane.b32.xlu1 %v404_v36, %s1669_s6 }
  0xdf   :  { %879 = vrot.lane.b32.xlu0 %v404_v36, %s1670_s7  ;;  %811 = vrot.lane.b32.xlu1 %v404_v36, %s1671_s8 }
  0xe3   :  { %956 = vrot.lane.b32.xlu0 %v1762_v38, %s1655_s19  ;;  %897 = vrot.lane.b32.xlu1 %v404_v36, %s1672_s9  ;;  %v760_v36 = vrot.slane %v746_v31, %v1713_v25 }
  0xe7   :  { %1002 = vrot.lane.b32.xlu0 %v1769_v40, %s1654_s1  ;;  %954 = vrot.lane.b32.xlu1 %v1769_v40, %s1655_s19 }
  0xeb   :  { %988 = vrot.lane.b32.xlu0 %v1780_v42, %s1673_s11  ;;  %1004 = vrot.lane.b32.xlu1 %v1762_v38, %s1654_s1  ;;  %v865_v42 = vcombine.high %v857_v8, %v857_v8 }
  0xef   :  { %1019 = vrot.lane.b32.xlu0 %v1769_v40, %s1656_s20  ;;  %1021 = vrot.lane.b32.xlu1 %v1762_v38, %s1656_s20 }
  0xf3   :  { %417 = vrot.lane.b32.xlu0 %v1793_v45, %s1655_s19  ;;  %415 = vrot.lane.b32.xlu1 %v1795_v46, %s1655_s19  ;;  %s1529_s19 = sld [smem:[#allocation5 + $0x25]] }
  0xf7   :  { %467 = vrot.lane.b32.xlu0 %v1793_v45, %s1654_s1  ;;  %450 = vrot.lane.b32.xlu1 %v1806_v48, %s1673_s11 }
  0xfb   :  { %483 = vrot.lane.b32.xlu0 %v1795_v46, %s1656_s20  ;;  %465 = vrot.lane.b32.xlu1 %v1795_v46, %s1654_s1  ;;  %s1524_s1 = sld [smem:[#allocation5 + $0x20]] }
  0xff   :  { %503 = vrot.lane.b32.xlu0 %v1793_v45, %s1657_s21  ;;  %485 = vrot.lane.b32.xlu1 %v1793_v45, %s1656_s20  ;;  %s1534_s20 = sld [smem:[#allocation5 + $0x2a]] }
 0x101   :  { %v1068_v53 = vstv %s1524_s1  ;;  %s2618_s1 = sld [smem:[#allocation5 + $0x21]] }
 0x102   :  { %v1069_v56 = vmul.f32 %v1068_v53, %v1725_v32 }
 0x103   :  { %519 = vrot.lane.b32.xlu0 %v1795_v46, %s1659_s23  ;;  %501 = vrot.lane.b32.xlu1 %v1795_v46, %s1657_s21 }
 0x107   :  { %554 = vrot.lane.b32.xlu0 %v1829_v51, %s1674_s13  ;;  %521 = vrot.lane.b32.xlu1 %v1793_v45, %s1659_s23 }
 0x10b   :  { %569 = vrot.lane.b32.xlu0 %v1795_v46, %s1661_s25  ;;  %571 = vrot.lane.b32.xlu1 %v1793_v45, %s1661_s25 }
 0x10f   :  { %589 = vrot.lane.b32.xlu0 %v1793_v45, %s1658_s22  ;;  %587 = vrot.lane.b32.xlu1 %v1795_v46, %s1658_s22 }
 0x113   :  { %605 = vrot.lane.b32.xlu0 %v1795_v46, %s1663_s27  ;;  %607 = vrot.lane.b32.xlu1 %v1793_v45, %s1663_s27 }
 0x117   :  { %625 = vrot.lane.b32.xlu0 %v1793_v45, %s1660_s24  ;;  %623 = vrot.lane.b32.xlu1 %v1795_v46, %s1660_s24 }
 0x11b   :  { %675 = vrot.lane.b32.xlu0 %v1793_v45, %s1662_s26  ;;  %658 = vrot.lane.b32.xlu1 %v1856_v54, %s1675_s16 }
 0x11f   :  { %691 = vrot.lane.b32.xlu0 %v1795_v46, %s1665_s29  ;;  %673 = vrot.lane.b32.xlu1 %v1795_v46, %s1662_s26 }
 0x123   :  { %711 = vrot.lane.b32.xlu0 %v1793_v45, %s1664_s28  ;;  %693 = vrot.lane.b32.xlu1 %v1793_v45, %s1665_s29 }
 0x127   :  { %727 = vrot.lane.b32.xlu0 %v1795_v46, %s1667_s3  ;;  %709 = vrot.lane.b32.xlu1 %v1795_v46, %s1664_s28 }
 0x128   :  { %v1877_v57 = vpop.permute.xlu1 %1000  ;;  %v1885_v59 = vpop.permute.xlu0 %952 }
 0x129   :  { %2861 = vst [vmem:[#allocation15_spill] sm:$0xff] %v1877_v57  ;;  %2862 = vst [vmem:[#allocation16_spill] sm:$0xff] %v1885_v59 }
 0x12b   :  { %762 = vrot.lane.b32.xlu0 %v1881_v58, %s1676_s17  ;;  %729 = vrot.lane.b32.xlu1 %v1793_v45, %s1667_s3 }
 0x12c   :  { %v1889_v60 = vpop.permute.xlu1 %1017 }
 0x12d   :  { %2863 = vst [vmem:[#allocation17_spill] sm:$0xff] %v1889_v60 }
 0x12f   :  { %777 = vrot.lane.b32.xlu0 %v1795_v46, %s1669_s6  ;;  %779 = vrot.lane.b32.xlu1 %v1793_v45, %s1669_s6 }
 0x131   :  { %v1895_v61 = vpop.permute.xlu0 %463  ;;  %v1897_v62 = vpop.permute.xlu1 %413 }
 0x133   :  { %797 = vrot.lane.b32.xlu0 %v1793_v45, %s1666_s30  ;;  %795 = vrot.lane.b32.xlu1 %v1795_v46, %s1666_s30 }
 0x135   :  { %v1903_v63 = vpop.permute.xlu0 %499  ;;  %v1905_v0 = vpop.permute.xlu1 %481 }
 0x137   :  { %813 = vrot.lane.b32.xlu0 %v1795_v46, %s1671_s8  ;;  %815 = vrot.lane.b32.xlu1 %v1793_v45, %s1671_s8 }
 0x139   :  { %v1911_v3 = vpop.permute.xlu0 %585  ;;  %v1913_v4 = vpop.permute.xlu1 %517 }
 0x13b   :  { %833 = vrot.lane.b32.xlu0 %v1793_v45, %s1668_s5  ;;  %831 = vrot.lane.b32.xlu1 %v1795_v46, %s1668_s5 }
 0x13d   :  { %v1920_v6 = vpop.permute.xlu0 %621  ;;  %v1922_v7 = vpop.permute.xlu1 %567 }
 0x13f   :  { %883 = vrot.lane.b32.xlu0 %v1793_v45, %s1670_s7  ;;  %866 = vrot.lane.b32.xlu1 %v857_v8, %s1677_s0 }
 0x141   :  { %v1928_v9 = vpop.permute.xlu0 %671  ;;  %v1930_v10 = vpop.permute.xlu1 %603 }
 0x143   :  { %899 = vrot.lane.b32.xlu0 %v1795_v46, %s1672_s9  ;;  %881 = vrot.lane.b32.xlu1 %v1795_v46, %s1670_s7 }
 0x145   :  { %v1938_v12 = vpop.permute.xlu0 %707  ;;  %v1941_v15 = vpop.permute.xlu1 %689 }
 0x147   :  { %992 = vrot.lane.b32.xlu0 %v986_v14, %s1673_s11  ;;  %901 = vrot.lane.b32.xlu1 %v1793_v45, %s1672_s9  ;;  %v850_v45 = vcombine.high %v848_v5, %v848_v5  ;;  %v1078_v5 = vrot.slane %v1069_v56, %v1713_v25 }
 0x149   :  { %v1946_v16 = vpop.permute.xlu0 %793  ;;  %v1950_v18 = vpop.permute.xlu1 %725  ;;  %v864_v48 = vrot.slane %v850_v45, %v1713_v25  ;;  %v1086_v11 = vcombine.high %v1078_v5, %v1078_v5 }
 0x14a   :  { %2864 = vst [vmem:[#allocation18_spill] sm:$0xff] %v1946_v16 }
 0x14b   :  { %452 = vrot.lane.b32.xlu0 %v449_v17, %s1673_s11  ;;  %990 = vrot.lane.b32.xlu1 %v987_v19, %s1673_s11  ;;  %v1071_v17 = vcombine.high %v1069_v56, %v1069_v56 }
 0x14d   :  { %v1960_v22 = vpop.permute.xlu0 %829  ;;  %v1963_v24 = vpop.permute.xlu1 %775  ;;  %v1085_v21 = vrot.slane %v1071_v17, %v1713_v25 }
 0x14e   :  { %2865 = vst [vmem:[#allocation19_spill] sm:$0xff] %v1960_v22  ;;  %2866 = vst [vmem:[#allocation20_spill] sm:$0xff] %v1963_v24 }
 0x14f   :  { %558 = vrot.lane.b32.xlu0 %v552_v23, %s1674_s13  ;;  %454 = vrot.lane.b32.xlu1 %v448_v26, %s1673_s11  ;;  %s2461_s11 = sld [smem:[#allocation5 + $0x14]] }
 0x151   :  { %v1968_v27 = vpop.permute.xlu0 %879  ;;  %v1972_v29 = vpop.permute.xlu1 %811 }
 0x152   :  { %2867 = vst [vmem:[#allocation21_spill] sm:$0xff] %v1968_v27  ;;  %2868 = vst [vmem:[#allocation22_spill] sm:$0xff] %v1972_v29 }
 0x153   :  { %660 = vrot.lane.b32.xlu0 %v657_v28, %s1675_s16  ;;  %556 = vrot.lane.b32.xlu1 %v553_v30, %s1674_s13 }
 0x155   :  { %v1982_v35 = vpop.permute.xlu0 %956  ;;  %v1985_v37 = vpop.permute.xlu1 %897 }
 0x156   :  { %2869 = vst [vmem:[#allocation23_spill] sm:$0xff] %v1982_v35  ;;  %2870 = vst [vmem:[#allocation24_spill] sm:$0xff] %v1985_v37 }
 0x157   :  { %766 = vrot.lane.b32.xlu0 %v760_v36, %s1676_s17  ;;  %662 = vrot.lane.b32.xlu1 %v656_v39, %s1675_s16 }
 0x159   :  { %v1990_v41 = vpop.permute.xlu0 %1002  ;;  %v1992_v43 = vpop.permute.xlu1 %954 }
 0x15a   :  { %2871 = vst [vmem:[#allocation25_spill] sm:$0xff] %v1990_v41  ;;  %2872 = vst [vmem:[#allocation26_spill] sm:$0xff] %v1992_v43 }
 0x15b   :  { %868 = vrot.lane.b32.xlu0 %v865_v42, %s1677_s0  ;;  %764 = vrot.lane.b32.xlu1 %v761_v44, %s1676_s17  ;;  %v1167_v42 = vstv %s1529_s19  ;;  %s1526_s19 = sld [smem:[#allocation5 + $0x22]] }
 0x15d   :  { %v1998_v46 = vpop.permute.xlu0 %988  ;;  %v2000_v47 = vpop.permute.xlu1 %1004 }
 0x15e   :  { %2873 = vst [vmem:[#allocation27_spill] sm:$0xff] %v1998_v46  ;;  %2874 = vst [vmem:[#allocation28_spill] sm:$0xff] %v2000_v47 }
 0x15f   :  { %1034 = vrot.lane.b32.xlu0 %v1729_v33, %s1657_s21  ;;  %870 = vrot.lane.b32.xlu1 %v864_v48, %s1677_s0  ;;  %v1168_v48 = vmul.f32 %v1167_v42, %v1725_v32 }
 0x161   :  { %v2006_v49 = vpop.permute.xlu0 %1019  ;;  %v2008_v50 = vpop.permute.xlu1 %1021  ;;  %v1170_v17 = vcombine.high %v1168_v48, %v1168_v48 }
 0x162   :  { %2875 = vst [vmem:[#allocation29_spill] sm:$0xff] %v2006_v49  ;;  %2876 = vst [vmem:[#allocation30_spill] sm:$0xff] %v2008_v50  ;;  %v1266_v49 = vstv %s1534_s20  ;;  %s1527_s20 = sld [smem:[#allocation5 + $0x23]] }
 0x163   :  { %1038 = vrot.lane.b32.xlu0 %v1762_v38, %s1657_s21  ;;  %1036 = vrot.lane.b32.xlu1 %v1769_v40, %s1657_s21  ;;  %v1184_v42 = vrot.slane %v1170_v17, %v1713_v25  ;;  %s1539_s21 = sld [smem:[#allocation5 + $0x2f]]  ;;  %v1267_v59 = vmul.f32 %v1266_v49, %v1725_v32 }
 0x165   :  { %v2014_v51 = vpop.permute.xlu0 %417  ;;  %v2016_v52 = vpop.permute.xlu1 %415  ;;  %v1276_v27 = vrot.slane %v1267_v59, %v1713_v25 }
 0x167   :  { %1053 = vrot.lane.b32.xlu0 %v1769_v40, %s1659_s23  ;;  %1051 = vrot.lane.b32.xlu1 %v1729_v33, %s1659_s23 }
 0x169   :  { %v2022_v54 = vpop.permute.xlu0 %467  ;;  %v2024_v55 = vpop.permute.xlu1 %450  ;;  %v1365_v22 = vstv %s1539_s21  ;;  %s2679_s21 = sld [smem:[#allocation5 + $0x24]] }
 0x16b   :  { %1099 = vrot.lane.b32.xlu0 %v1729_v33, %s1661_s25  ;;  %1055 = vrot.lane.b32.xlu1 %v1762_v38, %s1659_s23  ;;  %s2188_s23 = sld [smem:[#allocation5 + $0x1]] }
 0x16d   :  { %v2031_v58 = vpop.permute.xlu0 %483  ;;  %v2033_v1 = vpop.permute.xlu1 %465 }
 0x16f   :  { %1103 = vrot.lane.b32.xlu0 %v1762_v38, %s1661_s25  ;;  %1101 = vrot.lane.b32.xlu1 %v1769_v40, %s1661_s25  ;;  %s2202_s25 = sld [smem:[#allocation5 + $0x3]] }
 0x171   :  { %v2040_v8 = vpop.permute.xlu0 %503  ;;  %v2042_v14 = vpop.permute.xlu1 %485 }
 0x173   :  { %1089 = vrot.lane.b32.xlu0 %v1086_v11, %s1674_s13  ;;  %1087 = vrot.lane.b32.xlu1 %v1078_v5, %s1674_s13  ;;  %v1177_v5 = vrot.slane %v1168_v48, %v1713_v25 }
 0x175   :  { %v2046_v19 = vpop.permute.xlu0 %519  ;;  %v2048_v20 = vpop.permute.xlu1 %501  ;;  %v1185_v2 = vcombine.high %v1177_v5, %v1177_v5 }
 0x177   :  { %1116 = vrot.lane.b32.xlu0 %v1729_v33, %s1658_s22  ;;  %1091 = vrot.lane.b32.xlu1 %v1085_v21, %s1674_s13  ;;  %s2505_s13 = sld [smem:[#allocation5 + $0x17]] }
 0x179   :  { %v2054_v23 = vpop.permute.xlu0 %554  ;;  %v2056_v26 = vpop.permute.xlu1 %521 }
 0x17b   :  { %1120 = vrot.lane.b32.xlu0 %v1762_v38, %s1658_s22  ;;  %1118 = vrot.lane.b32.xlu1 %v1769_v40, %s1658_s22  ;;  %s2173_s22 = sld [smem:[#allocation5]] }
 0x17d   :  { %v2062_v28 = vpop.permute.xlu0 %569  ;;  %v2064_v30 = vpop.permute.xlu1 %571 }
 0x17f   :  { %1135 = vrot.lane.b32.xlu0 %v1769_v40, %s1663_s27  ;;  %1133 = vrot.lane.b32.xlu1 %v1729_v33, %s1663_s27 }
 0x181   :  { %v2070_v31 = vpop.permute.xlu0 %589  ;;  %v2072_v34 = vpop.permute.xlu1 %587 }
 0x183   :  { %1150 = vrot.lane.b32.xlu0 %v1729_v33, %s1660_s24  ;;  %1137 = vrot.lane.b32.xlu1 %v1762_v38, %s1663_s27  ;;  %s2219_s27 = sld [smem:[#allocation5 + $0x5]] }
 0x185   :  { %v2078_v36 = vpop.permute.xlu0 %605  ;;  %v2080_v39 = vpop.permute.xlu1 %607 }
 0x187   :  { %1154 = vrot.lane.b32.xlu0 %v1762_v38, %s1660_s24  ;;  %1152 = vrot.lane.b32.xlu1 %v1769_v40, %s1660_s24  ;;  %s2196_s24 = sld [smem:[#allocation5 + $0x4]] }
 0x189   :  { %v626_v44 = vpop.permute.xlu0 %625  ;;  %v2086_v45 = vpop.permute.xlu1 %623 }
 0x18a   :  { %v2091_v53 = vsel %vm2857_vm13, %v2086_v45, %v626_v44 }
 0x18b   :  { %1200 = vrot.lane.b32.xlu0 %v1769_v40, %s1662_s26  ;;  %1198 = vrot.lane.b32.xlu1 %v1729_v33, %s1662_s26 }
 0x18d   :  { %v676_v56 = vpop.permute.xlu0 %675  ;;  %v2098_v11 = vpop.permute.xlu1 %658 }
 0x18f   :  { %1186 = vrot.lane.b32.xlu0 %v1177_v5, %s1675_s16  ;;  %1202 = vrot.lane.b32.xlu1 %v1762_v38, %s1662_s26  ;;  %s2209_s26 = sld [smem:[#allocation5 + $0x6]] }
 0x191   :  { %v2103_v21 = vpop.permute.xlu0 %691  ;;  %v2106_v44 = vpop.permute.xlu1 %673 }
 0x192   :  { %v2110_v13 = vsel %vm2850_vm14, %v2106_v44, %v676_v56  ;;  %vm2855_vm14 = vcmask 1031168  }
 0x193   :  { %1190 = vrot.lane.b32.xlu0 %v1184_v42, %s1675_s16  ;;  %1188 = vrot.lane.b32.xlu1 %v1185_v2, %s1675_s16  ;;  %s2559_s16 = sld [smem:[#allocation5 + $0x1c]] }
 0x195   :  { %v712_v48 = vpop.permute.xlu0 %711  ;;  %v694_v50 = vpop.permute.xlu1 %693 }
 0x196   :  { %v2116_v46 = vsel %vm2849_vm15, %v2103_v21, %v694_v50  ;;  %vm573_vm15 = vcmask 891904  }
 0x197   :  { %2877 = vst [vmem:[#allocation31_spill] sm:$0xff] %v2116_v46  ;;  %1217 = vrot.lane.b32.xlu0 %v1769_v40, %s1665_s29  ;;  %1215 = vrot.lane.b32.xlu1 %v1729_v33, %s1665_s29 }
 0x199   :  { %v2122_v56 = vpop.permute.xlu0 %727  ;;  %v2124_v5 = vpop.permute.xlu1 %709 }
 0x19a   :  { %v2128_v2 = vsel %vm2847_vm0, %v2124_v5, %v712_v48  ;;  %vm505_vm0 = vcmask 916480  }
 0x19b   :  { %2878 = vst [vmem:[#allocation32_spill] sm:$0xff] %v2128_v2  ;;  %1232 = vrot.lane.b32.xlu0 %v1729_v33, %s1664_s28  ;;  %1219 = vrot.lane.b32.xlu1 %v1762_v38, %s1665_s29  ;;  %s2304_s29 = sld [smem:[#allocation5 + $0x9]] }
 0x19d   :  { %v2134_v50 = vpop.permute.xlu0 %762  ;;  %v730_v17 = vpop.permute.xlu1 %729 }
 0x19e   :  { %2879 = vst [vmem:[#allocation33_spill] sm:$0xff] %v2134_v50  ;;  %v2138_v42 = vsel %vm2846_vm1, %v2122_v56, %v730_v17  ;;  %v2883_v17 = vlaneseq  ;;  %vm2852_vm1 = vcmask 490496  }
 0x19f   :  { %2880 = vst [vmem:[#allocation34_spill] sm:$0xff] %v2138_v42  ;;  %1236 = vrot.lane.b32.xlu0 %v1762_v38, %s1664_s28  ;;  %1234 = vrot.lane.b32.xlu1 %v1769_v40, %s1664_s28  ;;  %s2224_s28 = sld [smem:[#allocation5 + $0x8]]  ;;  %v421_v42 = vsel %vm2843_vm8, %v2016_v52, %v2014_v51  ;;  %v494_v51 = vstv %s2196_s24 }
 0x1a0   :  { %v276_v57 = vand.u32 127, %v2883_v17  ;;  %s2710_s24 = sld [smem:[#allocation5 + $0x28]] }
 0x1a1   :  { %v2144_v48 = vpop.permute.xlu0 %777  ;;  %v780_v47 = vpop.permute.xlu1 %779 }
 0x1a2   :  { %2881 = vst [vmem:[#allocation35_spill] sm:$0xff] %v2144_v48  ;;  %v2148_v60 = vsel %vm2845_vm2, %v2144_v48, %v780_v47  ;;  %v277_v47 = vadd.s32 128, %v276_v57  ;;  %v2182_v50 = vand.u32 15, %v276_v57  ;;  %vm523_vm2 = vcmask 908288  }
 0x1a3   :  { %2882 = vst [vmem:[#allocation36_spill] sm:$0xff] %v2148_v60  ;;  %1251 = vrot.lane.b32.xlu0 %v1769_v40, %s1667_s3  ;;  %1249 = vrot.lane.b32.xlu1 %v1729_v33, %s1667_s3 }
 0x1a4   :  { %v2184_v60 = vand.u32 15, %v277_v47  ;;  %vm302_vm6 = vcmp.ge.s32.totalorder %v2182_v50, 2  ;;  %vm316_vm10 = vcmp.lt.s32.totalorder %v2182_v50, 15  ;;  %vm308_vm11 = vcmp.ge.s32.totalorder %v2182_v50, 1 }
 0x1a5   :  { %v798_v41 = vpop.permute.xlu0 %797  ;;  %v2155_v35 = vpop.permute.xlu1 %795 }
 0x1a6   :  { %2884 = vst [vmem:[#allocation37_spill] sm:$0xff] %v2155_v35  ;;  %v2160_v43 = vsel %vm2842_vm3, %v2155_v35, %v798_v41  ;;  %v1542_v41 = vld.sshfl [vmem:[#allocation4] sm:$0x33 pattern:$0x76325410]  ;;  %vm303_vm7 = vcmp.ge.s32.totalorder %v2184_v60, 2 }
 0x1a7   :  { %2885 = vst [vmem:[#allocation38_spill] sm:$0xff] %v2160_v43  ;;  %1297 = vrot.lane.b32.xlu0 %v1729_v33, %s1669_s6  ;;  %1253 = vrot.lane.b32.xlu1 %v1762_v38, %s1667_s3  ;;  %v2180_v43 = vmul.f32 %v1365_v22, %v1725_v32  ;;  %v385_v35 = vcombine.high %v1542_v41, %v1542_v41  ;;  %vm322_vm3 = vcmp.lt.s32.totalorder %v2182_v50, 14  ;;  %s2326_s3 = sld [smem:[#allocation5 + $0xb]] }
 0x1a9   :  { %v2166_v37 = vpop.permute.xlu0 %813  ;;  %v816_v17 = vpop.permute.xlu1 %815  ;;  %v2200_v32 = vrot.slane %v2180_v43, %v1713_v25  ;;  %v389_v47 = vsel %vm303_vm7, %v385_v35, 0.0 }
 0x1aa   :  { %2886 = vst [vmem:[#allocation39_spill] sm:$0xff] %v2166_v37  ;;  %v2171_v49 = vsel %vm2841_vm4, %v2166_v37, %v816_v17  ;;  %v1284_v17 = vcombine.high %v1276_v27, %v1276_v27  ;;  %v1269_v37 = vcombine.high %v1267_v59, %v1267_v59  ;;  %vm317_vm4 = vcmp.lt.s32.totalorder %v2184_v60, 15 }
 0x1ab   :  { %2887 = vst [vmem:[#allocation40_spill] sm:$0xff] %v2171_v49  ;;  %1301 = vrot.lane.b32.xlu0 %v1762_v38, %s1669_s6  ;;  %1299 = vrot.lane.b32.xlu1 %v1769_v40, %s1669_s6  ;;  %s2388_s6 = sld [smem:[#allocation5 + $0x10]] }
 0x1ac   :  { %v1283_v22 = vrot.slane %v1269_v37, %v1713_v25 }
 0x1ad   :  { %v834_v29 = vpop.permute.xlu0 %833  ;;  %v2186_v49 = vpop.permute.xlu1 %831 }
 0x1ae   :  { %2888 = vst [vmem:[#allocation41_spill] sm:$0xff] %v2186_v49  ;;  %v2192_v16 = vsel %vm2840_vm5, %v2186_v49, %v834_v29  ;;  %v390_v29 = vstv %s2173_s22  ;;  %v426_v49 = vstv %s2188_s23  ;;  %vm309_vm5 = vcmp.ge.s32.totalorder %v2184_v60, 1  ;;  %s2694_s22 = sld [smem:[#allocation5 + $0x26]] }
 0x1af   :  { %2889 = vst [vmem:[#allocation42_spill] sm:$0xff] %v2192_v16  ;;  %1287 = vrot.lane.b32.xlu0 %v1284_v17, %s1676_s17  ;;  %1285 = vrot.lane.b32.xlu1 %v1276_v27, %s1676_s17  ;;  %v388_v27 = vsel %vm302_vm6, %v1542_v41, 0.0  ;;  %v420_v17 = vsel %vm2843_vm8, %v1897_v62, %v2016_v52  ;;  %vm2854_vm8 = vcmask 1014784   ;;  %v425_v52 = vsel %vm309_vm5, %v421_v42, 0.0  ;;  %s2704_s23 = sld [smem:[#allocation5 + $0x27]] }
 0x1b0   :  { %v391_v16 = vmul.f32 %v390_v29, %v388_v27  ;;  %v424_v37 = vsel %vm308_vm11, %v420_v17, 0.0  ;;  %v470_v27 = vsel %vm2859_vm12, %v1895_v61, %v2033_v1  ;;  %v488_v17 = vsel %vm2854_vm8, %v1905_v0, %v2031_v58 }
 0x1b1   :  { %v884_v57 = vpop.permute.xlu0 %883  ;;  %v2206_v59 = vpop.permute.xlu1 %866  ;;  %v512_v42 = vstv %s2219_s27  ;;  %v428_v61 = vmul.f32 %v426_v49, %v425_v52  ;;  %v471_v0 = vsel %vm2859_vm12, %v2033_v1, %v2022_v54  ;;  %v474_v2 = vsel %vm316_vm10, %v470_v27, 0.0  ;;  %s2752_s27 = sld [smem:[#allocation5 + $0x2c]] }
 0x1b2   :  { %v489_v54 = vsel %vm2854_vm8, %v2031_v58, %v2042_v14  ;;  %v524_v1 = vsel %vm523_vm2, %v1913_v4, %v2046_v19  ;;  %vm560_vm8 = vcmask 900096   ;;  %vm664_vm12 = vcmask 769024  }
 0x1b3   :  { %1314 = vrot.lane.b32.xlu0 %v1729_v33, %s1666_s30  ;;  %1289 = vrot.lane.b32.xlu1 %v1283_v22, %s1676_s17  ;;  %v392_v22 = vmul.f32 %v390_v29, %v389_v47  ;;  %s2572_s17 = sld [smem:[#allocation5 + $0x1d]] }
 0x1b5   :  { %v2232_v62 = vpop.permute.xlu0 %899  ;;  %v2234_v41 = vpop.permute.xlu1 %881  ;;  %v430_v14 = vadd.f32 %v428_v61, %v392_v22 }
 0x1b6   :  { %2890 = vst [vmem:[#allocation43_spill] sm:$0xff] %v2232_v62  ;;  %2891 = vst [vmem:[#allocation44_spill] sm:$0xff] %v2234_v41  ;;  %v2244_v35 = vsel %vm2844_vm9, %v2234_v41, %v884_v57  ;;  %vm323_vm9 = vcmp.lt.s32.totalorder %v2184_v60, 14  ;;  %v427_v57 = vmul.f32 %v426_v49, %v424_v37  ;;  %v530_v37 = vstv %s2209_s26  ;;  %s2747_s26 = sld [smem:[#allocation5 + $0x2b]] }
 0x1b7   :  { %2892 = vst [vmem:[#allocation45_spill] sm:$0xff] %v2244_v35  ;;  %1318 = vrot.lane.b32.xlu0 %v1762_v38, %s1666_s30  ;;  %1316 = vrot.lane.b32.xlu1 %v1769_v40, %s1666_s30  ;;  %v476_v35 = vstv %s2202_s25  ;;  %s2319_s30 = sld [smem:[#allocation5 + $0xa]] }
 0x1b8   :  { %v429_v24 = vadd.f32 %v427_v57, %v391_v16  ;;  %v477_v16 = vmul.f32 %v476_v35, %v474_v2  ;;  %v507_v57 = vsel %vm505_vm0, %v2048_v20, %v2040_v8  ;;  %v493_v8 = vsel %vm323_vm9, %v489_v54, 0.0  ;;  %s2718_s25 = sld [smem:[#allocation5 + $0x29]] }
 0x1b9   :  { %v993_v29 = vpop.permute.xlu0 %992  ;;  %v902_v47 = vpop.permute.xlu1 %901 }
 0x1ba   :  { %v2266_v41 = vsel %vm2852_vm1, %v2232_v62, %v902_v47  ;;  %v580_v47 = vstv %s2224_s28  ;;  %v506_v62 = vsel %vm505_vm0, %v1903_v63, %v2048_v20  ;;  %vm2856_vm1 = vcmask 883712   ;;  %s2759_s28 = sld [smem:[#allocation5 + $0x2d]] }
 0x1bb   :  { %2893 = vst [vmem:[#allocation46_spill] sm:$0xff] %v2266_v41  ;;  %1333 = vrot.lane.b32.xlu0 %v1769_v40, %s1671_s8  ;;  %1331 = vrot.lane.b32.xlu1 %v1729_v33, %s1671_s8  ;;  %v492_v41 = vsel %vm322_vm3, %v488_v17, 0.0  ;;  %v475_v63 = vsel %vm317_vm4, %v471_v0, 0.0  ;;  %v510_v4 = vsel %vm302_vm6, %v506_v62, 0.0  ;;  %v511_v62 = vsel %vm303_vm7, %v507_v57, 0.0 }
 0x1bc   :  { %v495_v20 = vmul.f32 %v494_v51, %v492_v41  ;;  %v478_v17 = vmul.f32 %v476_v35, %v475_v63  ;;  %v513_v41 = vmul.f32 %v512_v42, %v510_v4  ;;  %v496_v0 = vmul.f32 %v494_v51, %v493_v8 }
 0x1bd   :  { %v453_v48 = vpop.permute.xlu0 %452  ;;  %v2285_v46 = vpop.permute.xlu1 %990  ;;  %v514_v51 = vmul.f32 %v512_v42, %v511_v62  ;;  %v628_v8 = vsel %vm2857_vm13, %v1920_v6, %v2086_v45  ;;  %vm2895_vm13 = vcmask 760832  }
 0x1be   :  { %v457_v49 = vsel %vm2855_vm14, %v2024_v55, %v453_v48  ;;  %v2297_v52 = vsel %vm2855_vm14, %v2285_v46, %v993_v29  ;;  %v525_v55 = vsel %vm523_vm2, %v2046_v19, %v2056_v26  ;;  %v574_v19 = vsel %vm573_vm15, %v1922_v7, %v2062_v28 }
 0x1bf   :  { %v461_v58 = vadd.f32 %v457_v49, %v429_v24  ;;  %1348 = vrot.lane.b32.xlu0 %v1729_v33, %s1668_s5  ;;  %1335 = vrot.lane.b32.xlu1 %v1762_v38, %s1671_s8  ;;  %v528_v24 = vsel %vm308_vm11, %v524_v1, 0.0  ;;  %v529_v22 = vsel %vm309_vm5, %v525_v55, 0.0  ;;  %v575_v7 = vsel %vm573_vm15, %v2062_v28, %v2064_v30  ;;  %s2400_s8 = sld [smem:[#allocation5 + $0xf]] }
 0x1c0   :  { %v531_v54 = vmul.f32 %v530_v37, %v528_v24  ;;  %v592_v1 = vsel %vm2856_vm1, %v1911_v3, %v2072_v34  ;;  %v2894_v28 = vcombine.high %v2180_v43, %v2180_v43  ;;  %v598_v55 = vstv %s2304_s29  ;;  %s2763_s29 = sld [smem:[#allocation5 + $0x2e]] }
 0x1c1   :  { %v479_v2 = vadd.f32 %v477_v16, %v461_v58  ;;  %v559_v27 = vpop.permute.xlu0 %558  ;;  %v455_v29 = vpop.permute.xlu1 %454  ;;  %v532_v58 = vmul.f32 %v530_v37, %v529_v22 }
 0x1c2   :  { %v458_v26 = vsel %vm2855_vm14, %v453_v48, %v455_v29  ;;  %vm2858_vm14 = vcmask 785408   ;;  %v578_v48 = vsel %vm316_vm10, %v574_v19, 0.0  ;;  %v1382_v30 = vrot.slane %v2894_v28, %v1713_v25 }
 0x1c3   :  { %v497_v61 = vadd.f32 %v495_v20, %v479_v2  ;;  %1352 = vrot.lane.b32.xlu0 %v1762_v38, %s1668_s5  ;;  %v462_v35 = vadd.f32 %v458_v26, %v430_v14  ;;  %1350 = vrot.lane.b32.xlu1 %v1769_v40, %s1668_s5  ;;  %v610_v3 = vsel %vm2858_vm14, %v1930_v10, %v2078_v36  ;;  %v579_v25 = vsel %vm317_vm4, %v575_v7, 0.0  ;;  %s2370_s5 = sld [smem:[#allocation5 + $0xd]] }
 0x1c4   :  { %v581_v43 = vmul.f32 %v580_v47, %v578_v48  ;;  %v593_v10 = vsel %vm2856_vm1, %v2072_v34, %v2070_v31  ;;  %v611_v37 = vsel %vm2858_vm14, %v2078_v36, %v2080_v39  ;;  %v616_v31 = vstv %s2319_s30  ;;  %s2798_s30 = sld [smem:[#allocation5 + $0x30]] }
 0x1c5   :  { %v480_v49 = vadd.f32 %v478_v17, %v462_v35  ;;  %v2343_v63 = vpop.permute.xlu0 %660  ;;  %v557_v16 = vpop.permute.xlu1 %556  ;;  %v515_v57 = vadd.f32 %v513_v41, %v497_v61  ;;  %v614_v34 = vsel %vm302_vm6, %v610_v3, 0.0  ;;  %v634_v17 = vstv %s2326_s3  ;;  %s2803_s3 = sld [smem:[#allocation5 + $0x31]] }
 0x1c6   :  { %v561_v4 = vsel %vm560_vm8, %v2054_v23, %v557_v16  ;;  %v596_v23 = vsel %vm322_vm3, %v592_v1, 0.0  ;;  %vm872_vm1 = vcmask 506880   ;;  %v597_v36 = vsel %vm323_vm9, %v593_v10, 0.0  ;;  %v2900_v10 = vld [vmem:[#allocation31_spill] sm:$0xff] }
 0x1c7   :  { %v498_v14 = vadd.f32 %v496_v0, %v480_v49  ;;  %1398 = vrot.lane.b32.xlu0 %v1769_v40, %s1670_s7  ;;  %v533_v42 = vadd.f32 %v531_v54, %v515_v57  ;;  %1396 = vrot.lane.b32.xlu1 %v1729_v33, %s1670_s7  ;;  %v599_v39 = vmul.f32 %v598_v55, %v596_v23  ;;  %v615_v19 = vsel %vm303_vm7, %v611_v37, 0.0 }
 0x1c8   :  { %v582_v62 = vmul.f32 %v580_v47, %v579_v25  ;;  %v632_v26 = vsel %vm308_vm11, %v628_v8, 0.0  ;;  %v562_v41 = vsel %vm560_vm8, %v557_v16, %v559_v27  ;;  %v617_v22 = vmul.f32 %v616_v31, %v614_v34 }
 0x1c9   :  { %v516_v20 = vadd.f32 %v514_v51, %v498_v14  ;;  %v565_v24 = vadd.f32 %v561_v4, %v533_v42  ;;  %v2378_v2 = vpop.permute.xlu0 %766  ;;  %v2380_v29 = vpop.permute.xlu1 %662  ;;  %v678_v61 = vsel %vm2895_vm13, %v1928_v9, %v2106_v44  ;;  %v600_v7 = vmul.f32 %v598_v55, %v597_v36  ;;  %v2901_v36 = vld [vmem:[#allocation35_spill] sm:$0xff] }
 0x1ca   :  { %vm2896_vm14 = vcmask 752640   ;;  %v633_v9 = vsel %vm309_vm5, %v2091_v53, 0.0  ;;  %v635_v44 = vmul.f32 %v634_v17, %v632_v26  ;;  %v2897_v16 = vcombine.high %v2200_v32, %v2200_v32 }
 0x1cb   :  { %v534_v6 = vadd.f32 %v532_v58, %v516_v20  ;;  %v583_v45 = vadd.f32 %v581_v43, %v565_v24  ;;  %1384 = vrot.lane.b32.xlu0 %v2200_v32, %s1677_s0  ;;  %1400 = vrot.lane.b32.xlu1 %v1762_v38, %s1670_s7  ;;  %v696_v48 = vsel %vm2896_vm14, %v1941_v15, %v2103_v21  ;;  %v702_v21 = vstv %s2355_s4  ;;  %s2432_s7 = sld [smem:[#allocation5 + $0x12]]  ;;  %s1679_s4 = smov [#allocation10]  }
 0x1cc   :  { %v618_v15 = vmul.f32 %v616_v31, %v615_v19  ;;  %v684_v57 = vstv %s2370_s5  ;;  %v700_v51 = vsel %vm322_vm3, %v696_v48, 0.0  ;;  %vm2898_vm13 = vcmask 654336   ;;  %s1480_s5 = sshll.u32 %s1679_s4, 4  ;;  %s1481_s5 = int_to_ptr.vmem [resolvable:$true] %s1480_s5 }
 0x1cd   :  { %v566_v35 = vadd.f32 %v562_v41, %v534_v6  ;;  %v601_v0 = vadd.f32 %v599_v39, %v583_v45  ;;  %v869_v47 = vpop.permute.xlu0 %868  ;;  %v2406_v54 = vpop.permute.xlu1 %764  ;;  %v714_v53 = vsel %vm2898_vm13, %v1938_v12, %v2124_v5  ;;  %vm2899_vm14 = vcmask 646144   ;;  %v2902_v39 = vld [vmem:[#allocation20_spill] sm:$0xff]  ;;  %v2905_v41 = vld [vmem:[#allocation34_spill] sm:$0xff]  ;;  %p1626_p6 = scmp.lt.s32.totalorder %s1481_s5, %s1481_s5 }
 0x1ce   :  { %v2413_v27 = vsel %vm872_vm1, %v2206_v59, %v869_v47  ;;  %v682_v59 = vsel %vm316_vm10, %v678_v61, 0.0  ;;  %v732_v55 = vsel %vm2899_vm14, %v1950_v18, %v2122_v56  ;;  %v665_v3 = vsel %vm664_vm12, %v2098_v11, %v2343_v63  ;;  %v2906_v61 = vld [vmem:[#allocation37_spill] sm:$0xff] }
 0x1cf   :  { %v584_v1 = vadd.f32 %v582_v62, %v566_v35  ;;  %v619_v49 = vadd.f32 %v617_v22, %v601_v0  ;;  %1388 = vrot.lane.b32.xlu0 %v1382_v30, %s1677_s0  ;;  %1386 = vrot.lane.b32.xlu1 %v2897_v16, %s1677_s0  ;;  %v636_v30 = vmul.f32 %v634_v17, %v633_v9  ;;  %v683_v5 = vsel %vm317_vm4, %v2110_v13, 0.0  ;;  %v2907_v35 = vld [vmem:[#allocation18_spill] sm:$0xff]  ;;  %s2597_s0 = sld [smem:[#allocation5 + $0x1f]] }
 0x1d0   :  { %v685_v14 = vmul.f32 %v684_v57, %v682_v59  ;;  %v703_v18 = vmul.f32 %v702_v21, %v700_v51  ;;  %v738_v56 = vstv %s2388_s6  ;;  %v720_v43 = vstv %s2400_s8  ;;  %s1621_s6 = scalar_lea.vmem %s1481_s5, 64 }
 0x1d1   :  { %v602_v58 = vadd.f32 %v600_v7, %v584_v1  ;;  %v637_v4 = vadd.f32 %v635_v44, %v619_v49  ;;  %v1035_v32 = vpop.permute.xlu0 %1034  ;;  %v871_v28 = vpop.permute.xlu1 %870  ;;  %v718_v11 = vsel %vm302_vm6, %v714_v53, 0.0  ;;  %v701_v23 = vsel %vm323_vm9, %v2900_v10, 0.0  ;;  %p1622_p5 = scmp.ne.s32.totalorder %s1481_s5, %s1621_s6  ;;  %p1627_p7 = scmp.lt.s32.totalorder %s1621_s6, %s1621_s6 }
 0x1d2   :  { %v2443_v12 = vsel %vm872_vm1, %v869_v47, %v871_v28  ;;  %v736_v13 = vsel %vm308_vm11, %v732_v55, 0.0  ;;  %v686_v24 = vmul.f32 %v684_v57, %v683_v5  ;;  %v721_v17 = vmul.f32 %v720_v43, %v718_v11  ;;  %v2913_v28 = vld [vmem:[#allocation33_spill] sm:$0xff]  ;;  %v2915_v5 = vld [vmem:[#allocation19_spill] sm:$0xff] }
 0x1d3   :  { %v620_v42 = vadd.f32 %v618_v15, %v602_v58  ;;  %v669_v25 = vadd.f32 %v665_v3, %v637_v4  ;;  %1415 = vrot.lane.b32.xlu0 %v1769_v40, %s1672_s9  ;;  %1413 = vrot.lane.b32.xlu1 %v1729_v33, %s1672_s9  ;;  %v666_v33 = vsel %vm664_vm12, %v2343_v63, %v2380_v29  ;;  %vm2903_vm13 = vcmask 629760   ;;  %v2904_v29 = vld [vmem:[#allocation32_spill] sm:$0xff]  ;;  %v2909_v15 = vld [vmem:[#allocation39_spill] sm:$0xff]  ;;  %v2914_v3 = vld [vmem:[#allocation41_spill] sm:$0xff]  ;;  %p1628_p8 = por %p1627_p7, %p1626_p6 }
 0x1d4   :  { %v782_v6 = vsel %vm2903_vm13, %v2902_v39, %v2901_v36  ;;  %v704_v19 = vmul.f32 %v702_v21, %v701_v23  ;;  %v739_v63 = vmul.f32 %v738_v56, %v736_v13  ;;  %v719_v26 = vsel %vm303_vm7, %v2904_v29, 0.0  ;;  %v2910_v21 = vld [vmem:[#allocation22_spill] sm:$0xff]  ;;  %v2912_v58 = vld [vmem:[#allocation36_spill] sm:$0xff] }
 0x1d5   :  { %v638_v37 = vadd.f32 %v636_v30, %v620_v42  ;;  %v687_v8 = vadd.f32 %v685_v14, %v669_v25  ;;  %v1039_v20 = vpop.permute.xlu0 %1038  ;;  %v1037_v40 = vpop.permute.xlu1 %1036  ;;  %v737_v22 = vsel %vm309_vm5, %v2905_v41, 0.0  ;;  %vm2908_vm14 = vcmask 621568   ;;  %v2917_v23 = vld [vmem:[#allocation38_spill] sm:$0xff]  ;;  %v2918_v39 = vld [vmem:[#allocation44_spill] sm:$0xff]  ;;  %p1629_p9 = pnand %p1628_p8, %p1622_p5 }
 0x1d6   :  { %v2467_v31 = vsel %vm505_vm0, %v1035_v32, %v1037_v40  ;;  %v2470_v34 = vsel %vm505_vm0, %v1037_v40, %v1039_v20  ;;  %vm768_vm0 = vcmask 637952   ;;  %v800_v0 = vsel %vm2908_vm14, %v2907_v35, %v2906_v61  ;;  %v2921_v41 = vld [vmem:[#allocation40_spill] sm:$0xff]  ;;  %v1543_v61 = vld.sshfl [vmem:[#allocation4 + $0x6] sm:$0x33 pattern:$0x76325410] }
 0x1d7   :  { %v670_v45 = vadd.f32 %v666_v33, %v638_v37  ;;  %v705_v62 = vadd.f32 %v703_v18, %v687_v8  ;;  %1417 = vrot.lane.b32.xlu1 %v1762_v38, %s1672_s9  ;;  %v788_v9 = vstv %s2432_s7  ;;  %v786_v44 = vsel %vm316_vm10, %v782_v6, 0.0  ;;  %s2498_s9 = sld [smem:[#allocation5 + $0x19]]  ;;  %v2919_v6 = vld [vmem:[#allocation21_spill] sm:$0xff] }
 0x1d8   :  { %v806_v1 = vstv %s2437_s10  ;;  %v722_v16 = vmul.f32 %v720_v43, %v719_v26  ;;  %vm2911_vm13 = vcmask 523264   ;;  %v740_v53 = vmul.f32 %v738_v56, %v737_v22 }
 0x1d9   :  { %v688_v47 = vadd.f32 %v686_v24, %v670_v45  ;;  %v723_v7 = vadd.f32 %v721_v17, %v705_v62  ;;  %v1054_v38 = vpop.permute.xlu0 %1053  ;;  %v1052_v48 = vpop.permute.xlu1 %1051  ;;  %v818_v57 = vsel %vm2911_vm13, %v2910_v21, %v2909_v15  ;;  %v787_v4 = vsel %vm317_vm4, %v2912_v58, 0.0 }
 0x1da   :  { %v2493_v49 = vsel %vm523_vm2, %v1052_v48, %v1054_v38  ;;  %v804_v32 = vsel %vm322_vm3, %v800_v0, 0.0  ;;  %v769_v30 = vsel %vm768_vm0, %v2913_v28, %v2406_v54  ;;  %v789_v55 = vmul.f32 %v788_v9, %v786_v44  ;;  %v2922_v0 = vld [vmem:[#allocation43_spill] sm:$0xff] }
 0x1db   :  { %v706_v59 = vadd.f32 %v704_v19, %v688_v47  ;;  %v741_v51 = vadd.f32 %v739_v63, %v723_v7  ;;  %vm2916_vm14 = vcmask 515072   ;;  %v824_v43 = vstv %s2461_s11  ;;  %v2923_v47 = vld [vmem:[#allocation24_spill] sm:$0xff] }
 0x1dc   :  { %v836_v14 = vsel %vm2916_vm14, %v2915_v5, %v2914_v3  ;;  %v822_v11 = vsel %vm302_vm6, %v818_v57, 0.0  ;;  %v805_v13 = vsel %vm323_vm9, %v2917_v23, 0.0  ;;  %v807_v37 = vmul.f32 %v806_v1, %v804_v32  ;;  %v2927_v32 = vld [vmem:[#allocation16_spill] sm:$0xff] }
 0x1dd   :  { %v724_v42 = vadd.f32 %v722_v16, %v706_v59  ;;  %v773_v25 = vadd.f32 %v769_v30, %v741_v51  ;;  %v1100_v18 = vpop.permute.xlu0 %1099  ;;  %v1056_v56 = vpop.permute.xlu1 %1055  ;;  %v790_v40 = vmul.f32 %v788_v9, %v787_v4  ;;  %v842_v24 = vstv %s2480_s12  ;;  %v2925_v9 = vld [vmem:[#allocation42_spill] sm:$0xff] }
 0x1de   :  { %v2519_v10 = vsel %vm523_vm2, %v1054_v38, %v1056_v56  ;;  %v840_v33 = vsel %vm308_vm11, %v836_v14, 0.0  ;;  %v770_v17 = vsel %vm768_vm0, %v2406_v54, %v2378_v2  ;;  %v825_v36 = vmul.f32 %v824_v43, %v822_v11  ;;  %v2926_v4 = vld [vmem:[#allocation26_spill] sm:$0xff]  ;;  %v2929_v56 = vld [vmem:[#allocation23_spill] sm:$0xff]  ;;  %v2931_v11 = vld [vmem:[#allocation45_spill] sm:$0xff] }
 0x1df   :  { %v742_v8 = vadd.f32 %v740_v53, %v724_v42  ;;  %v791_v20 = vadd.f32 %v789_v55, %v773_v25  ;;  %vm2920_vm2 = vcmask 498688   ;;  %v808_v26 = vmul.f32 %v806_v1, %v805_v13 }
 0x1e0   :  { %v886_v45 = vsel %vm2920_vm2, %v2919_v6, %v2918_v39  ;;  %v823_v22 = vsel %vm303_vm7, %v2921_v41, 0.0  ;;  %v843_v54 = vmul.f32 %v842_v24, %v840_v33  ;;  %vm2924_vm13 = vcmask 490496   ;;  %v2932_v33 = vld [vmem:[#allocation46_spill] sm:$0xff]  ;;  %v2933_v6 = vld [vmem:[#allocation25_spill] sm:$0xff] }
 0x1e1   :  { %v774_v62 = vadd.f32 %v770_v17, %v742_v8  ;;  %v809_v19 = vadd.f32 %v807_v37, %v791_v20  ;;  %v1104_v63 = vpop.permute.xlu0 %1103  ;;  %v1102_v29 = vpop.permute.xlu1 %1101  ;;  %v904_v7 = vsel %vm2924_vm13, %v2923_v47, %v2922_v0  ;;  %v841_v44 = vsel %vm309_vm5, %v2925_v9, 0.0 }
 0x1e2   :  { %v2539_v35 = vsel %vm573_vm15, %v1100_v18, %v1102_v29  ;;  %v2542_v2 = vsel %vm573_vm15, %v1102_v29, %v1104_v63  ;;  %v892_v1 = vstv %s2505_s13  ;;  %v890_v16 = vsel %vm316_vm10, %v886_v45, 0.0  ;;  %v2934_v45 = vld [vmem:[#allocation15_spill] sm:$0xff] }
 0x1e3   :  { %v792_v38 = vadd.f32 %v790_v40, %v774_v62  ;;  %v827_v48 = vadd.f32 %v825_v36, %v809_v19  ;;  %v929_v15 = vstv %s2498_s9  ;;  %v826_v21 = vmul.f32 %v824_v43, %v823_v22 }
 0x1e4   :  { %v927_v51 = vsel %vm302_vm6, %v1543_v61, 0.0  ;;  %vm2928_vm15 = vcmask 1039360   ;;  %v910_v30 = vstv %s2516_s14  ;;  %v908_v55 = vsel %vm322_vm3, %v904_v7, 0.0 }
 0x1e5   :  { %v810_v57 = vadd.f32 %v808_v26, %v792_v38  ;;  %v845_v59 = vadd.f32 %v843_v54, %v827_v48  ;;  %v1090_v53 = vpop.permute.xlu0 %1089  ;;  %v1088_v58 = vpop.permute.xlu1 %1087  ;;  %v958_v28 = vsel %vm2928_vm15, %v2927_v32, %v2926_v4  ;;  %v844_v5 = vmul.f32 %v842_v24, %v841_v44  ;;  %vm2930_vm14 = vmmov %vm2928_vm15  ;;  %v2937_v54 = vld [vmem:[#allocation17_spill] sm:$0xff] }
 0x1e6   :  { %v2565_v3 = vsel %vm560_vm8, %v1088_v58, %v1090_v53  ;;  %v893_v14 = vmul.f32 %v892_v1, %v890_v16  ;;  %v964_v18 = vstv %s2524_s15  ;;  %v959_v43 = vsel %vm2930_vm14, %v2926_v4, %v2929_v56  ;;  %v2941_v4 = vld [vmem:[#allocation27_spill] sm:$0xff] }
 0x1e7   :  { %v877_v42 = vadd.f32 %v2413_v27, %v845_v59  ;;  %v828_v25 = vadd.f32 %v826_v21, %v810_v57  ;;  %v891_v23 = vsel %vm317_vm4, %v2931_v11, 0.0  ;;  %v924_v13 = vcombine.high %v1543_v61, %v1543_v61  ;;  %v2936_v61 = vld [vmem:[#allocation29_spill] sm:$0xff] }
 0x1e8   :  { %v962_v37 = vsel %vm308_vm11, %v958_v28, 0.0  ;;  %v911_v8 = vmul.f32 %v910_v30, %v908_v55  ;;  %v909_v17 = vsel %vm323_vm9, %v2932_v33, 0.0  ;;  %v930_v36 = vmul.f32 %v929_v15, %v927_v51 }
 0x1e9   :  { %v895_v20 = vadd.f32 %v893_v14, %v877_v42  ;;  %v846_v40 = vadd.f32 %v844_v5, %v828_v25  ;;  %v2579_v27 = vpop.permute.xlu0 %1116  ;;  %v1092_v24 = vpop.permute.xlu1 %1091  ;;  %vm2935_vm2 = vcmask 1022976   ;;  %v894_v19 = vmul.f32 %v892_v1, %v891_v23  ;;  %v2939_v1 = vld [vmem:[#allocation28_spill] sm:$0xff] }
 0x1ea   :  { %v2587_v39 = vsel %vm560_vm8, %v1090_v53, %v1092_v24  ;;  %v1006_v62 = vsel %vm2935_vm2, %v2934_v45, %v2933_v6  ;;  %v963_v26 = vsel %vm309_vm5, %v959_v43, 0.0  ;;  %v965_v41 = vmul.f32 %v964_v18, %v962_v37  ;;  %vm2940_vm13 = vmmov %vm2935_vm2 }
 0x1eb   :  { %v878_v63 = vadd.f32 %v2443_v12, %v846_v40  ;;  %v913_v29 = vadd.f32 %v911_v8, %v895_v20  ;;  %v928_v22 = vsel %vm303_vm7, %v924_v13, 0.0  ;;  %vm2938_vm8 = vcmask 1014784  }
 0x1ec   :  { %v1023_v0 = vsel %vm2938_vm8, %v2937_v54, %v2936_v61  ;;  %v912_v47 = vmul.f32 %v910_v30, %v909_v17  ;;  %v1010_v9 = vsel %vm316_vm10, %v1006_v62, 0.0  ;;  %v1012_v44 = vstv %s2559_s16  ;;  %v2943_v30 = vld [vmem:[#allocation30_spill] sm:$0xff]  ;;  %vm2944_vm14 = vmmov %vm2938_vm8 }
 0x1ed   :  { %v896_v7 = vadd.f32 %v894_v19, %v878_v63  ;;  %v932_v38 = vadd.f32 %v930_v36, %v913_v29  ;;  %v2602_v48 = vpop.permute.xlu0 %1120  ;;  %v2604_v12 = vpop.permute.xlu1 %1118  ;;  %v1007_v16 = vsel %vm2940_vm13, %v2933_v6, %v2939_v1  ;;  %v931_v21 = vmul.f32 %v929_v15, %v928_v22 }
 0x1ee   :  { %v966_v51 = vmul.f32 %v964_v18, %v963_v26  ;;  %v1027_v53 = vsel %vm322_vm3, %v1023_v0, 0.0  ;;  %v1029_v58 = vstv %s2572_s17  ;;  %vm2942_vm15 = vcmask 1031168  }
 0x1ef   :  { %v914_v57 = vadd.f32 %v912_v47, %v896_v7  ;;  %v967_v59 = vadd.f32 %v965_v41, %v932_v38  ;;  %v994_v32 = vsel %vm2942_vm15, %v2941_v4, %v2285_v46  ;;  %v1013_v28 = vmul.f32 %v1012_v44, %v1010_v9 }
 0x1f0   :  { %v1024_v55 = vsel %vm2944_vm14, %v2936_v61, %v2943_v30  ;;  %v1011_v25 = vsel %vm317_vm4, %v1007_v16, 0.0  ;;  %v1046_v18 = vstv %s2584_s18  ;;  %v1044_v46 = vsel %vm302_vm6, %v2467_v31, 0.0 }
 0x1f1   :  { %v933_v15 = vadd.f32 %v931_v21, %v914_v57  ;;  %v998_v5 = vadd.f32 %v994_v32, %v967_v59  ;;  %v2623_v14 = vpop.permute.xlu0 %1135  ;;  %v2625_v42 = vpop.permute.xlu1 %1133  ;;  %v1030_v56 = vmul.f32 %v1029_v58, %v1027_v53  ;;  %v1028_v23 = vsel %vm323_vm9, %v1024_v55, 0.0 }
 0x1f2   :  { %v1063_v13 = vstv %s2597_s0  ;;  %v1061_v37 = vsel %vm308_vm11, %v2493_v49, 0.0  ;;  %v1014_v8 = vmul.f32 %v1012_v44, %v1011_v25  ;;  %v1047_v24 = vmul.f32 %v1046_v18, %v1044_v46 }
 0x1f3   :  { %v968_v43 = vadd.f32 %v966_v51, %v933_v15  ;;  %v1015_v11 = vadd.f32 %v1013_v28, %v998_v5  ;;  %v1045_v17 = vsel %vm303_vm7, %v2470_v34, 0.0  ;;  %v1031_v36 = vmul.f32 %v1029_v58, %v1028_v23 }
 0x1f4   :  { %v1064_v62 = vmul.f32 %v1063_v13, %v1061_v37  ;;  %v1062_v49 = vsel %vm309_vm5, %v2519_v10, 0.0  ;;  %v1111_v19 = vstv %s2618_s1  ;;  %v1048_v29 = vmul.f32 %v1046_v18, %v1045_v17 }
 0x1f5   :  { %v999_v20 = vadd.f32 %v2297_v52, %v968_v43  ;;  %v1032_v40 = vadd.f32 %v1030_v56, %v1015_v11  ;;  %v2640_v33 = vpop.permute.xlu0 %1150  ;;  %v1138_v31 = vpop.permute.xlu1 %1137  ;;  %v1109_v52 = vsel %vm316_vm10, %v2539_v35, 0.0  ;;  %v1065_v34 = vmul.f32 %v1063_v13, %v1062_v49 }
 0x1f6   :  { %v1112_v54 = vmul.f32 %v1111_v19, %v1109_v52  ;;  %v1110_v47 = vsel %vm317_vm4, %v2542_v2, 0.0  ;;  %vm2945_vm2 = vcmask 883712   ;;  %v1128_v5 = vstv %s1526_s19 }
 0x1f7   :  { %v1016_v6 = vadd.f32 %v1014_v8, %v999_v20  ;;  %v1049_v45 = vadd.f32 %v1047_v24, %v1032_v40  ;;  %v1113_v35 = vmul.f32 %v1111_v19, %v1110_v47  ;;  %v1122_v55 = vsel %vm2945_vm2, %v2579_v27, %v2604_v12  ;;  %vm2946_vm8 = vmmov %vm2945_vm2 }
 0x1f8   :  { %v1123_v15 = vsel %vm2946_vm8, %v2604_v12, %v2602_v48  ;;  %v1126_v25 = vsel %vm322_vm3, %v1122_v55, 0.0  ;;  %vm2947_vm13 = vcmask 785408   ;;  %v1145_v11 = vstv %s1527_s20 }
 0x1f9   :  { %v1033_v63 = vadd.f32 %v1031_v36, %v1016_v6  ;;  %v1066_v26 = vadd.f32 %v1064_v62, %v1049_v45  ;;  %v1155_v41 = vpop.permute.xlu0 %1154  ;;  %v1153_v22 = vpop.permute.xlu1 %1152  ;;  %v1127_v56 = vsel %vm323_vm9, %v1123_v15, 0.0  ;;  %v1139_v27 = vsel %vm2947_vm13, %v2625_v42, %v2623_v14  ;;  %vm2948_vm15 = vmmov %vm2947_vm13 }
 0x1fa   :  { %v1140_v48 = vsel %vm2948_vm15, %v2623_v14, %v1138_v31  ;;  %v1129_v12 = vmul.f32 %v1128_v5, %v1126_v25  ;;  %v1130_v43 = vmul.f32 %v1128_v5, %v1127_v56  ;;  %v1143_v23 = vsel %vm302_vm6, %v1139_v27, 0.0 }
 0x1fb   :  { %v1050_v61 = vadd.f32 %v1048_v29, %v1033_v63  ;;  %v1097_v0 = vadd.f32 %v2565_v3, %v1066_v26  ;;  %v1144_v42 = vsel %vm303_vm7, %v1140_v48, 0.0  ;;  %vm2949_vm14 = vcmask 777216  }
 0x1fc   :  { %v1156_v14 = vsel %vm2949_vm14, %v2640_v33, %v1153_v22  ;;  %vm2950_vm2 = vmmov %vm2949_vm14  ;;  %v1146_v24 = vmul.f32 %v1145_v11, %v1143_v23  ;;  %v1147_v31 = vmul.f32 %v1145_v11, %v1144_v42  ;;  %v1162_v17 = vstv %s2679_s21 }
 0x1fd   :  { %v1114_v10 = vadd.f32 %v1112_v54, %v1097_v0  ;;  %v1067_v7 = vadd.f32 %v1065_v34, %v1050_v61  ;;  %v2656_v38 = vpop.permute.xlu0 %1200  ;;  %v1199_v9 = vpop.permute.xlu1 %1198  ;;  %v1157_v40 = vsel %vm2950_vm2, %v1153_v22, %v1155_v41  ;;  %v1160_v36 = vsel %vm308_vm11, %v1156_v14, 0.0 }
 0x1fe   :  { %v1161_v33 = vsel %vm309_vm5, %v1157_v40, 0.0  ;;  %vm2951_vm8 = vcmask 760832   ;;  %v1163_v52 = vmul.f32 %v1162_v17, %v1160_v36  ;;  %vm2952_vm13 = vcmask 752640  }
 0x1ff   :  { %v1098_v44 = vadd.f32 %v2587_v39, %v1067_v7  ;;  %v1131_v8 = vadd.f32 %v1129_v12, %v1114_v10  ;;  %v1204_v19 = vsel %vm2951_vm8, %v1199_v9, %v2656_v38  ;;  %v1164_v29 = vmul.f32 %v1162_v17, %v1161_v33  ;;  %vm2954_vm14 = vmmov %vm2951_vm8 }
 0x200   :  { %v1210_v26 = vstv %s2694_s22  ;;  %v1208_v34 = vsel %vm316_vm10, %v1204_v19, 0.0  ;;  %v1227_v0 = vstv %s2704_s23  ;;  %vm2953_vm15 = vcmask 654336   ;;  %vm2955_vm2 = vmmov %vm2952_vm13 }
 0x201   :  { %v1115_v1 = vadd.f32 %v1113_v35, %v1098_v44  ;;  %v1187_v16 = vpop.permute.xlu0 %1186  ;;  %v1203_v21 = vpop.permute.xlu1 %1202  ;;  %v1148_v62 = vadd.f32 %v1146_v24, %v1131_v8  ;;  %vm2956_vm8 = vcmask 646144  }
 0x202   :  { %v1205_v10 = vsel %vm2954_vm14, %v2656_v38, %v1203_v21  ;;  %vm2960_vm14 = vcmask 621568  }
 0x203   :  { %v1132_v20 = vadd.f32 %v1130_v43, %v1115_v1  ;;  %v1165_v54 = vadd.f32 %v1163_v52, %v1148_v62  ;;  %v1209_v15 = vsel %vm317_vm4, %v1205_v10, 0.0  ;;  %v1309_v62 = vstv %s2747_s26 }
 0x205   :  { %v2659_v57 = vpop.permute.xlu0 %1190  ;;  %v2661_v59 = vpop.permute.xlu1 %1188  ;;  %v1149_v49 = vadd.f32 %v1147_v31, %v1132_v20 }
 0x206   :  { %v1192_v41 = vsel %vm664_vm12, %v1187_v16, %v2661_v59  ;;  %v1211_v16 = vmul.f32 %v1210_v26, %v1208_v34  ;;  %v1343_v34 = vstv %s2759_s28 }
 0x207   :  { %v1166_v7 = vadd.f32 %v1164_v29, %v1149_v49  ;;  %v1196_v44 = vadd.f32 %v1192_v41, %v1165_v54 }
 0x209   :  { %v1218_v3 = vpop.permute.xlu0 %1217  ;;  %v1216_v51 = vpop.permute.xlu1 %1215  ;;  %v1213_v25 = vadd.f32 %v1211_v16, %v1196_v44 }
 0x20a   :  { %v1221_v63 = vsel %vm2952_vm13, %v1216_v51, %v1218_v3  ;;  %v1244_v51 = vstv %s2710_s24  ;;  %vm2957_vm13 = vmmov %vm2953_vm15 }
 0x20b   :  { %v1225_v9 = vsel %vm322_vm3, %v1221_v63, 0.0 }
 0x20d   :  { %v1233_v53 = vpop.permute.xlu0 %1232  ;;  %v1220_v58 = vpop.permute.xlu1 %1219 }
 0x20e   :  { %v1222_v35 = vsel %vm2955_vm2, %v1218_v3, %v1220_v58  ;;  %v1193_v3 = vsel %vm664_vm12, %v2661_v59, %v2659_v57  ;;  %v1228_v58 = vmul.f32 %v1227_v0, %v1225_v9  ;;  %vm2958_vm12 = vmmov %vm2956_vm8  ;;  %v1212_v59 = vmul.f32 %v1210_v26, %v1209_v15 }
 0x20f   :  { %v1197_v5 = vadd.f32 %v1193_v3, %v1166_v7  ;;  %vm2961_vm2 = vcmask 523264  }
 0x210   :  { %v1230_v11 = vadd.f32 %v1228_v58, %v1213_v25 }
 0x211   :  { %v2663_v2 = vpop.permute.xlu0 %1236  ;;  %v1235_v4 = vpop.permute.xlu1 %1234  ;;  %v1214_v8 = vadd.f32 %v1212_v59, %v1197_v5 }
 0x212   :  { %v1238_v47 = vsel %vm2953_vm15, %v1233_v53, %v1235_v4  ;;  %v1239_v55 = vsel %vm2957_vm13, %v1235_v4, %v2663_v2  ;;  %v1261_v2 = vstv %s2718_s25  ;;  %vm2959_vm15 = vcmask 629760   ;;  %vm2963_vm13 = vmmov %vm2960_vm14 }
 0x213   :  { %v1242_v53 = vsel %vm302_vm6, %v1238_v47, 0.0  ;;  %v1243_v56 = vsel %vm303_vm7, %v1239_v55, 0.0 }
 0x214   :  { %v1245_v27 = vmul.f32 %v1244_v51, %v1242_v53  ;;  %v1246_v42 = vmul.f32 %v1244_v51, %v1243_v56 }
 0x215   :  { %v2665_v32 = vpop.permute.xlu0 %1251  ;;  %v1250_v28 = vpop.permute.xlu1 %1249 }
 0x216   :  { %v1255_v1 = vsel %vm2956_vm8, %v1250_v28, %v2665_v32  ;;  %v1226_v28 = vsel %vm323_vm9, %v1222_v35, 0.0  ;;  %v1247_v20 = vadd.f32 %v1245_v27, %v1230_v11  ;;  %vm2962_vm8 = vmmov %vm2959_vm15 }
 0x217   :  { %v1259_v4 = vsel %vm308_vm11, %v1255_v1, 0.0  ;;  %v1229_v48 = vmul.f32 %v1227_v0, %v1226_v28 }
 0x218   :  { %v1262_v23 = vmul.f32 %v1261_v2, %v1259_v4 }
 0x219   :  { %v2667_v39 = vpop.permute.xlu0 %1297  ;;  %v2669_v30 = vpop.permute.xlu1 %1253  ;;  %v1231_v40 = vadd.f32 %v1229_v48, %v1214_v8  ;;  %v1408_v48 = vstv %s2798_s30 }
 0x21a   :  { %v1256_v57 = vsel %vm2958_vm12, %v2665_v32, %v2669_v30  ;;  %v1264_v33 = vadd.f32 %v1262_v23, %v1247_v20  ;;  %vm2964_vm12 = vcmask 515072  }
 0x21b   :  { %v1260_v14 = vsel %vm309_vm5, %v1256_v57, 0.0  ;;  %v1248_v19 = vadd.f32 %v1246_v42, %v1231_v40 }
 0x21c   :  { %v1263_v36 = vmul.f32 %v1261_v2, %v1260_v14  ;;  %v1425_v14 = vstv %s2803_s3 }
 0x21d   :  { %v2681_v18 = vpop.permute.xlu0 %1301  ;;  %v2683_v46 = vpop.permute.xlu1 %1299 }
 0x21e   :  { %v1303_v32 = vsel %vm2959_vm15, %v2667_v39, %v2683_v46  ;;  %v1326_v39 = vstv %s2752_s27  ;;  %v1265_v7 = vadd.f32 %v1263_v36, %v1248_v19  ;;  %vm2965_vm15 = vmmov %vm2961_vm2 }
 0x21f   :  { %v1307_v52 = vsel %vm316_vm10, %v1303_v32, 0.0 }
 0x220   :  { %v1310_v10 = vmul.f32 %v1309_v62, %v1307_v52 }
 0x221   :  { %v2696_v13 = vpop.permute.xlu0 %1287  ;;  %v2698_v37 = vpop.permute.xlu1 %1285 }
 0x222   :  { %v1291_v24 = vsel %vm768_vm0, %v2698_v37, %v2696_v13  ;;  %v1304_v37 = vsel %vm2962_vm8, %v2683_v46, %v2681_v18 }
 0x223   :  { %v1295_v63 = vadd.f32 %v1291_v24, %v1264_v33  ;;  %v1308_v46 = vsel %vm317_vm4, %v1304_v37, 0.0 }
 0x224   :  { %v1311_v53 = vmul.f32 %v1309_v62, %v1308_v46 }
 0x225   :  { %v1315_v6 = vpop.permute.xlu0 %1314  ;;  %v2712_v45 = vpop.permute.xlu1 %1289 }
 0x226   :  { %v1292_v41 = vsel %vm768_vm0, %v2696_v13, %v2712_v45  ;;  %v1312_v45 = vadd.f32 %v1310_v10, %v1295_v63 }
 0x227   :  { %v1296_v35 = vadd.f32 %v1292_v41, %v1265_v7 }
 0x229   :  { %v1319_v22 = vpop.permute.xlu0 %1318  ;;  %v1317_v61 = vpop.permute.xlu1 %1316  ;;  %v1313_v58 = vadd.f32 %v1311_v53, %v1296_v35 }
 0x22a   :  { %v1320_v30 = vsel %vm2960_vm14, %v1315_v6, %v1317_v61  ;;  %v1321_v29 = vsel %vm2963_vm13, %v1317_v61, %v1319_v22  ;;  %v1360_v61 = vstv %s2763_s29 }
 0x22b   :  { %v1324_v6 = vsel %vm322_vm3, %v1320_v30, 0.0  ;;  %v1325_v22 = vsel %vm323_vm9, %v1321_v29, 0.0 }
 0x22c   :  { %v1327_v9 = vmul.f32 %v1326_v39, %v1324_v6 }
 0x22d   :  { %v1334_v38 = vpop.permute.xlu0 %1333  ;;  %v1332_v21 = vpop.permute.xlu1 %1331 }
 0x22e   :  { %v1337_v49 = vsel %vm2961_vm2, %v1332_v21, %v1334_v38  ;;  %v1329_v21 = vadd.f32 %v1327_v9, %v1312_v45  ;;  %v2971_v9 = vld [vmem:[#allocation14_spill] sm:$0xff] }
 0x22f   :  { %v1341_v54 = vsel %vm302_vm6, %v1337_v49, 0.0  ;;  %vm2966_vm6 = vmmov %vm2964_vm12 }
 0x230   :  { %v1344_v44 = vmul.f32 %v1343_v34, %v1341_v54 }
 0x231   :  { %v1349_v12 = vpop.permute.xlu0 %1348  ;;  %v1336_v43 = vpop.permute.xlu1 %1335 }
 0x232   :  { %v1338_v18 = vsel %vm2965_vm15, %v1334_v38, %v1336_v43  ;;  %v1328_v38 = vmul.f32 %v1326_v39, %v1325_v22  ;;  %v1346_v28 = vadd.f32 %v1344_v44, %v1329_v21 }
 0x233   :  { %v1342_v16 = vsel %vm303_vm7, %v1338_v18, 0.0 }
 0x234   :  { %v1345_v5 = vmul.f32 %v1343_v34, %v1342_v16  ;;  %v1330_v56 = vadd.f32 %v1328_v38, %v1313_v58 }
 0x235   :  { %v1353_v31 = vpop.permute.xlu0 %1352  ;;  %v1351_v17 = vpop.permute.xlu1 %1350 }
 0x236   :  { %v1354_v26 = vsel %vm2964_vm12, %v1349_v12, %v1351_v17  ;;  %v1355_v1 = vsel %vm2966_vm6, %v1351_v17, %v1353_v31  ;;  %v1347_v43 = vadd.f32 %v1345_v5, %v1330_v56 }
 0x237   :  { %v1358_v13 = vsel %vm308_vm11, %v1354_v26, 0.0  ;;  %v1359_v3 = vsel %vm309_vm5, %v1355_v1, 0.0  ;;  %vm2967_vm11 = vcmask 498688   ;;  %vm2969_vm5 = vcmask 490496  }
 0x238   :  { %v1361_v15 = vmul.f32 %v1360_v61, %v1358_v13  ;;  %v1362_v27 = vmul.f32 %v1360_v61, %v1359_v3  ;;  %vm2968_vm7 = vmmov %vm2967_vm11  ;;  %v2972_v61 = vlaneseq }
 0x239   :  { %v1399_v0 = vpop.permute.xlu0 %1398  ;;  %v1397_v47 = vpop.permute.xlu1 %1396 }
 0x23a   :  { %v1402_v2 = vsel %vm2967_vm11, %v1397_v47, %v1399_v0  ;;  %v1363_v57 = vadd.f32 %v1361_v15, %v1346_v28  ;;  %v1364_v30 = vadd.f32 %v1362_v27, %v1347_v43 }
 0x23b   :  { %v1406_v12 = vsel %vm316_vm10, %v1402_v2, 0.0 }
 0x23c   :  { %v1409_v32 = vmul.f32 %v1408_v48, %v1406_v12 }
 0x23d   :  { %v1385_v51 = vpop.permute.xlu0 %1384  ;;  %v1401_v55 = vpop.permute.xlu1 %1400 }
 0x23e   :  { %v1403_v11 = vsel %vm2968_vm7, %v1399_v0, %v1401_v55  ;;  %v1678_v0 = vmov 1966171168  }
 0x23f   :  { %v1407_v24 = vsel %vm317_vm4, %v1403_v11, 0.0  ;;  %v1446_v47 = vunpack.c.l.s4 %v1678_v0 }
 0x240   :  { %v1410_v49 = vmul.f32 %v1408_v48, %v1407_v24 }
 0x241   :  { %v1389_v4 = vpop.permute.xlu0 %1388  ;;  %v1387_v25 = vpop.permute.xlu1 %1386  ;;  %v1447_v10 = vunpack.c.0.s8 %v1446_v47 }
 0x242   :  { %v1390_v59 = vsel %vm872_vm1, %v1385_v51, %v1387_v25  ;;  %v1391_v8 = vsel %vm872_vm1, %v1387_v25, %v1389_v4  ;;  %vm2970_vm1 = vmmov %vm2969_vm5 }
 0x243   :  { %v1394_v23 = vadd.f32 %v1390_v59, %v1363_v57  ;;  %v1395_v17 = vadd.f32 %v1391_v8, %v1364_v30  ;;  %v1450_v60 = vsub.s32 %v1447_v10, %v2971_v9 }
 0x245   :  { %v1416_v42 = vpop.permute.xlu0 %1415  ;;  %v1414_v20 = vpop.permute.xlu1 %1413  ;;  %v1411_v36 = vadd.f32 %v1409_v32, %v1394_v23  ;;  %v1412_v6 = vadd.f32 %v1410_v49, %v1395_v17 }
 0x246   :  { %v1419_v40 = vsel %vm2969_vm5, %v1414_v20, %v1416_v42 }
 0x247   :  { %v1423_v31 = vsel %vm322_vm3, %v1419_v40, 0.0  ;;  %vm1471_vm3 = vcmp.lt.s32.totalorder %v2972_v61, 256 }
 0x248   :  { %v1426_v62 = vmul.f32 %v1425_v14, %v1423_v31 }
 0x249   :  { %v1418_v33 = vpop.permute.xlu1 %1417 }
 0x24a   :  { %v1428_v19 = vadd.f32 %v1426_v62, %v1411_v36  ;;  %v1420_v52 = vsel %vm2970_vm1, %v1416_v42, %v1418_v33 }
 0x24b   :  { %v1424_v39 = vsel %vm323_vm9, %v1420_v52, 0.0 }
 0x24c   :  { %v1544_v37 = vmul.f32 -1.442695, %v1428_v19  ;;  %v1427_v63 = vmul.f32 %v1425_v14, %v1424_v39 }
 0x24e   :  { %1585 = vpow2.f32 %v1544_v37  ;;  %v1429_v29 = vadd.f32 %v1427_v63, %v1412_v6 }
 0x250   :  { %v1545_v26 = vmul.f32 -1.442695, %v1429_v29 }
 0x252   :  { %1587 = vpow2.f32 %v1545_v26 }
 0x25b   :  { %v1586_v50 = vpop.eup %1585 }
 0x25c   :  { %v1436_v41 = vadd.f32 1.0, %v1586_v50 }
 0x25e   :  { %1589 = vrcp.f32 %v1436_v41 }
 0x25f   :  { %v1588_v34 = vpop.eup %1587 }
 0x260   :  { %v1437_v54 = vadd.f32 1.0, %v1588_v34 }
 0x262   :  { %1591 = vrcp.f32 %v1437_v54 }
 0x26b   :  { %v1590_v7 = vpop.eup %1589 }
 0x26f   :  { %v1592_v18 = vpop.eup %1591 }
 0x270   :  { %v1444_v46 = vcombine.low %v1590_v7, %v1592_v18 }
 0x272   :  { %v1451_v22 = vrot.slane %v1444_v46, %v1450_v60 }
 0x274   :  { %v1452_v13 = vcombine.high %v1451_v22, %v1451_v22  ;;  %v1459_v45 = vrot.slane %v1451_v22, %v1450_v60 }
 0x276   :  { %v1466_v35 = vrot.slane %v1452_v13, %v1450_v60  ;;  %1473 = vst.msk [vmem:[#allocation10] sm:$0x3] %vm1471_vm3, %v1459_v45 }
 0x278   :  { %1474 = vst.msk [vmem:[#allocation10 + $0x2] sm:$0x3] %vm1471_vm3, %v1466_v35 }
 0x279   :  { %1632 = shalt.err (!%p1629_p9)
}
 0x27a   :  { %s1680_s8 = smov 32   ;;  %s1681_s7 = smov 2  }
 0x27b   :  { %1486 = dma.vmem_to_hbm [thread:$0]  %s1481_s5, 64, %s2830_s2, [#allocation7], %s1680_s8, %s1680_s8, %s1681_s7  }
 0x27c   :  { %1645 = dma.done.wait [#allocation7], 64  }
 0x27d   :  { %1646 = vsyncadd [#allocation7], 4294967232 }
 0x27e   :  { %1490 = vsyncpa [#allocation6], 1 }
 0x27f   :  { %1491 = vsyncpa [#allocation7], 1 }
 0x280   :  { %1492 = vsyncpa [#allocation8], 1 }

</bundles_post_ra>
